<compile_context>
chip_gen: v7x
topology: tpu7x:2x2x1
jax: 0.10.0
libtpu: 0.0.40
codegen_flags: <defaults>
</compile_context>

<pallas_src>
import jax
import jax.numpy as jnp
from jax import lax
from jax.experimental import pallas as pl
from jax.experimental.pallas import tpu as pltpu


# ----------------------------------------------------------------------------
# Pallas kernel 1: fused ResNet BasicBlock (3x3 conv -> ReLU -> 3x3 conv
#                  + residual -> ReLU), patches built in VMEM.
# ----------------------------------------------------------------------------
def _conv3x3_from_padded(src_ref, w_ref, H, W, C):
    """3x3 conv read from a zero-padded (H+2, W+2, C) f32 VMEM ref.

    The 9 taps are static shifted slices of the scratch (in-VMEM im2col);
    each tap is cast to bf16 right before the MXU dot, accumulation is f32.
    """
    hw = H * W
    acc = jnp.zeros((hw, C), jnp.float32)
    for dy in range(3):
        for dx in range(3):
            tap = (src_ref[dy:dy + H, dx:dx + W, :]
                   .reshape(hw, C).astype(jnp.bfloat16))
            acc = acc + jnp.dot(tap, w_ref[dy * 3 + dx],
                                preferred_element_type=jnp.float32)
    return acc


def make_basic_block(B, H, W, C):
    """Returns apply(feat, w1, b1, w2, b2) for feat of shape (B, H*W, C) bf16."""
    HW = H * W

    def kernel(x_ref, w1_ref, b1_ref, w2_ref, b2_ref, o_ref, xpad, h1pad):
        x = x_ref[0]                                        # (HW, C) bf16
        # Zero-padded copy of the input tile (halo for the 3x3 taps).
        xpad[...] = jnp.zeros_like(xpad)
        xpad[1:H + 1, 1:W + 1, :] = x.reshape(H, W, C).astype(jnp.float32)

        # conv1 + folded BN bias + ReLU
        h1 = jnp.maximum(_conv3x3_from_padded(xpad, w1_ref, H, W, C)
                         + b1_ref[...], 0.0)                # (HW, C) f32
        h1pad[...] = jnp.zeros_like(h1pad)
        h1pad[1:H + 1, 1:W + 1, :] = h1.reshape(H, W, C)

        # conv2 + folded BN bias + residual + ReLU
        h2 = (_conv3x3_from_padded(h1pad, w2_ref, H, W, C)
              + b2_ref[...] + x.astype(jnp.float32))
        o_ref[0] = jnp.maximum(h2, 0.0).astype(o_ref.dtype)

    def apply(feat, w1, b1, w2, b2):
        return pl.pallas_call(
            kernel,
            out_shape=jax.ShapeDtypeStruct((B, HW, C), jnp.bfloat16),
            grid=(B,),
            in_specs=[
                pl.BlockSpec((1, HW, C), lambda b: (b, 0, 0)),
                pl.BlockSpec((9, C, C), lambda b: (0, 0, 0)),
                pl.BlockSpec((1, C), lambda b: (0, 0)),
                pl.BlockSpec((9, C, C), lambda b: (0, 0, 0)),
                pl.BlockSpec((1, C), lambda b: (0, 0)),
            ],
            out_specs=pl.BlockSpec((1, HW, C), lambda b: (b, 0, 0)),
            scratch_shapes=[
                pltpu.VMEM((H + 2, W + 2, C), jnp.float32),   # padded input
                pltpu.VMEM((H + 2, W + 2, C), jnp.float32),   # padded conv1 out
            ],
            compiler_params=pltpu.CompilerParams(
                dimension_semantics=("parallel",)),
        )(feat, w1, b1, w2, b2)

    return apply


# ----------------------------------------------------------------------------
# Pallas kernel 2: fused head = attention 1x1 conv + sigmoid + concat +
#                  AdaptiveAvgPool2d(1) + Linear.
# ----------------------------------------------------------------------------
def make_head(B, HW, C, G, NCLS):
    inv_hw = 1.0 / float(HW)

    def kernel(f_ref, attw_ref, attb_ref, lwf_ref, lwa_ref, lb_ref, o_ref):
        f = f_ref[0]                                                  # (HW, C) bf16
        att = jax.nn.sigmoid(
            jnp.dot(f, attw_ref[...], preferred_element_type=jnp.float32)
            + attb_ref[...])                                          # (HW, G) f32
        pooled_f = jnp.sum(f.astype(jnp.float32), axis=0, keepdims=True) * inv_hw
        pooled_a = jnp.sum(att, axis=0, keepdims=True) * inv_hw
        # cat([feat, group_feat]) @ W  ==  feat @ W_feat + group_feat @ W_att
        logits = (jnp.dot(pooled_f, lwf_ref[...], preferred_element_type=jnp.float32)
                  + jnp.dot(pooled_a, lwa_ref[...], preferred_element_type=jnp.float32)
                  + lb_ref[...])                                      # (1, NCLS)
        o_ref[0] = logits

    def apply(feat, attw, attb, lwf, lwa, lb):
        out = pl.pallas_call(
            kernel,
            out_shape=jax.ShapeDtypeStruct((B, 1, NCLS), jnp.float32),
            grid=(B,),
            in_specs=[
                pl.BlockSpec((1, HW, C), lambda b: (b, 0, 0)),
                pl.BlockSpec((C, G), lambda b: (0, 0)),
                pl.BlockSpec((1, G), lambda b: (0, 0)),
                pl.BlockSpec((C, NCLS), lambda b: (0, 0)),
                pl.BlockSpec((G, NCLS), lambda b: (0, 0)),
                pl.BlockSpec((1, NCLS), lambda b: (0, 0)),
            ],
            out_specs=pl.BlockSpec((1, 1, NCLS), lambda b: (b, 0, 0)),
            compiler_params=pltpu.CompilerParams(
                dimension_semantics=("parallel",)),
        )(feat, attw, attb, lwf, lwa, lb)
        return out.reshape(B, NCLS)

    return apply


# ----------------------------------------------------------------------------
# parameters (deterministic synthetic init; BN folded into bf16 conv weights)
# ----------------------------------------------------------------------------
def init_params(key, n_clses=10, n_groups=16):
    keys = iter(jax.random.split(key, 32))
    eps = 1e-5

    def bn_fold(cout):
        gamma = jax.random.uniform(next(keys), (cout,), minval=0.5, maxval=1.5)
        beta = jax.random.normal(next(keys), (cout,)) * 0.1
        mean = jax.random.normal(next(keys), (cout,)) * 0.1
        var = jax.random.uniform(next(keys), (cout,), minval=0.5, maxval=1.5)
        scale = gamma / jnp.sqrt(var + eps)
        return scale, (beta - mean * scale).astype(jnp.float32)

    p = {}
    # resnet18 conv1 (7x7, 3->64) + bn1, folded; HWIO bf16 for lax.conv.
    w = jax.random.normal(next(keys), (64, 3, 7, 7), jnp.float32) * 0.05
    scale, bias = bn_fold(64)
    p["conv1_w"] = (jnp.transpose(w, (2, 3, 1, 0)) * scale).astype(jnp.bfloat16)
    p["conv1_b"] = bias                                    # (64,), broadcasts over NHWC

    def conv3x3_bn(cin, cout):
        w = jax.random.normal(next(keys), (cout, cin, 3, 3), jnp.float32) * 0.05
        scale, bias = bn_fold(cout)
        # (cout,cin,3,3) -> (3,3,cin,cout) -> (9,cin,cout), BN folded, bf16 MXU operand.
        w_t = jnp.transpose(w, (2, 3, 1, 0)) * scale
        return w_t.reshape(9, cin, cout).astype(jnp.bfloat16), bias[None, :]

    for blk in ("l1b0", "l1b1"):                           # layer1: 2 BasicBlocks
        p[f"{blk}_c1_w"], p[f"{blk}_c1_b"] = conv3x3_bn(64, 64)
        p[f"{blk}_c2_w"], p[f"{blk}_c2_b"] = conv3x3_bn(64, 64)

    # attention head: 1x1 conv 64 -> n_groups (with bias), bf16 weight.
    p["att_w"] = (jax.random.normal(next(keys), (64, n_groups), jnp.float32)
                  * 0.05).astype(jnp.bfloat16)
    p["att_b"] = ((jax.random.normal(next(keys), (n_groups,)) * 0.05)[None, :]
                  .astype(jnp.float32))
    # classifier Linear(64 + n_groups, n_clses) — weight split so the channel
    # concat can be fused away inside the head kernel.
    lw = jax.random.normal(next(keys), (64 + n_groups, n_clses), jnp.float32) * 0.05
    p["lin_w_feat"] = lw[:64]
    p["lin_w_att"] = lw[64:]
    p["lin_b"] = ((jax.random.normal(next(keys), (n_clses,)) * 0.05)[None, :]
                  .astype(jnp.float32))
    return p


# ----------------------------------------------------------------------------
# forward (eval branch of MACNN.forward)
# ----------------------------------------------------------------------------
def macnn_forward(params, x_nchw, gt_score=None):
    del gt_score  # only used by the training branch (not implemented)
    x = jnp.transpose(x_nchw, (0, 2, 3, 1)).astype(jnp.bfloat16)     # NCHW -> NHWC

    # ---- conv1 7x7/2 pad3 (+ folded BN) + ReLU: XLA native conv (per review —
    # im2col would duplicate the 3-channel input ~12x with non-aligned K=147).
    y = lax.conv_general_dilated(
        x, params["conv1_w"], window_strides=(2, 2), padding=((3, 3), (3, 3)),
        dimension_numbers=("NHWC", "HWIO", "NHWC"),
        preferred_element_type=jnp.float32)
    y = jnp.maximum(y + params["conv1_b"], 0.0)                      # (B,H1,W1,64) f32

    # ---- maxpool 3x3 / stride 2 / pad 1: fused tree of max over 9 strided
    # slices (single XLA fusion, no (M,9,64) HBM intermediate).
    B, H1, W1, C = y.shape
    Ho, Wo = (H1 + 2 - 3) // 2 + 1, (W1 + 2 - 3) // 2 + 1
    yp = jnp.pad(y, ((0, 0), (1, 1), (1, 1), (0, 0)), constant_values=-jnp.inf)
    h = None
    for dy in range(3):
        for dx in range(3):
            win = yp[:, dy:dy + 2 * Ho:2, dx:dx + 2 * Wo:2, :]
            h = win if h is None else jnp.maximum(h, win)
    h = h.astype(jnp.bfloat16).reshape(B, Ho * Wo, C)                # (B, HW, 64) bf16

    # ---- layer1: two fused BasicBlock Pallas kernels (bf16 activations in HBM)
    # Note: per-batch blocks assume H*W*C fits VMEM; for large spatial maps the
    # grid would gain a halo-tiled H axis.
    block = make_basic_block(B, Ho, Wo, C)
    for blk in ("l1b0", "l1b1"):
        h = block(h, params[f"{blk}_c1_w"], params[f"{blk}_c1_b"],
                  params[f"{blk}_c2_w"], params[f"{blk}_c2_b"])

    # ---- fused head: attention + sigmoid + concat + avg-pool + linear --------
    head = make_head(B, Ho * Wo, C,
                     params["att_w"].shape[1], params["lin_b"].shape[1])
    logits = head(h, params["att_w"], params["att_b"],
                  params["lin_w_feat"], params["lin_w_att"], params["lin_b"])
    return jnp.argmax(logits, axis=1)                                # eval: logit.argmax(1)


# ----------------------------------------------------------------------------
if __name__ == "__main__":
    n_clses, n_groups = 10, 16
    kx, kp = jax.random.split(jax.random.PRNGKey(0))
    # RGB input (resnet conv1 expects 3 channels); 32x32 -> 8x8 backbone feature.
    x = jax.random.normal(kx, (2, 3, 32, 32), jnp.float32)           # NCHW like torch
    gt_score = jnp.zeros((2,), jnp.int32)                            # unused in eval

    params = init_params(kp, n_clses=n_clses, n_groups=n_groups)

    fwd = jax.jit(lambda inp: macnn_forward(params, inp, gt_score))
    preds = fwd(x)
    jax.block_until_ready(preds)
    assert preds.shape == (2,) and preds.dtype in (jnp.int32, jnp.int64)
    print("KERNEL_OK")
</pallas_src>

<mosaic_0001>
module attributes {stable_mosaic.version = 11 : i64} {
  func.func @kernel(%arg0: i32, %arg1: memref<1x64x64xbf16, #tpu.memory_space<vmem>>, %arg2: memref<9x64x64xbf16, #tpu.memory_space<vmem>>, %arg3: memref<1x64xf32, #tpu.memory_space<vmem>>, %arg4: memref<9x64x64xbf16, #tpu.memory_space<vmem>>, %arg5: memref<1x64xf32, #tpu.memory_space<vmem>>, %arg6: memref<1x64x64xbf16, #tpu.memory_space<vmem>>, %arg7: memref<10x10x64xf32, #tpu.memory_space<vmem>>, %arg8: memref<10x10x64xf32, #tpu.memory_space<vmem>>) attributes {dimension_semantics = [#tpu.dimension_semantics<parallel>], iteration_bounds = array<i64: 2>, scalar_prefetch = 0 : i64, scratch_operands = 2 : i64, tpu.core_type = #tpu.core_type<tc>, window_params = [{transform_indices = @transform_0, window_bounds = array<i64: 1, 64, 64>}, {pipeline_mode = #tpu.pipeline_mode<synchronous>, transform_indices = @transform_1, window_bounds = array<i64: 9, 64, 64>}, {pipeline_mode = #tpu.pipeline_mode<synchronous>, transform_indices = @transform_2, window_bounds = array<i64: 1, 64>}, {pipeline_mode = #tpu.pipeline_mode<synchronous>, transform_indices = @transform_3, window_bounds = array<i64: 9, 64, 64>}, {pipeline_mode = #tpu.pipeline_mode<synchronous>, transform_indices = @transform_4, window_bounds = array<i64: 1, 64>}, {transform_indices = @transform_5, window_bounds = array<i64: 1, 64, 64>}]} {
    %c0 = arith.constant 0 : index
    %c0_0 = arith.constant 0 : index
    %c0_1 = arith.constant 0 : index
    %0 = vector.load %arg1[%c0, %c0_0, %c0_1] : memref<1x64x64xbf16, #tpu.memory_space<vmem>>, vector<1x64x64xbf16>
    %1 = vector.shape_cast %0 : vector<1x64x64xbf16> to vector<64x64xbf16>
    %cst = arith.constant 0.000000e+00 : f32
    %2 = vector.broadcast %cst : f32 to vector<10x10x64xf32>
    %c0_2 = arith.constant 0 : index
    %c0_3 = arith.constant 0 : index
    %c0_4 = arith.constant 0 : index
    %3 = vector.load %arg7[%c0_2, %c0_3, %c0_4] : memref<10x10x64xf32, #tpu.memory_space<vmem>>, vector<10x10x64xf32>
    tpu.vector_store %arg7[%c0_2, %c0_3, %c0_4], %2 {strides = array<i32>} : memref<10x10x64xf32, #tpu.memory_space<vmem>>, vector<10x10x64xf32>,
    %4 = vector.shape_cast %1 : vector<64x64xbf16> to vector<8x8x64xbf16>
    %5 = arith.extf %4 : vector<8x8x64xbf16> to vector<8x8x64xf32>
    %c1 = arith.constant 1 : index
    %c1_5 = arith.constant 1 : index
    %c0_6 = arith.constant 0 : index
    %6 = vector.load %arg7[%c1, %c1_5, %c0_6] : memref<10x10x64xf32, #tpu.memory_space<vmem>>, vector<8x8x64xf32>
    tpu.vector_store %arg7[%c1, %c1_5, %c0_6], %5 {strides = array<i32>} : memref<10x10x64xf32, #tpu.memory_space<vmem>>, vector<8x8x64xf32>,
    %cst_7 = arith.constant 0.000000e+00 : f32
    %7 = vector.broadcast %cst_7 : f32 to vector<64x64xf32>
    %c0_8 = arith.constant 0 : index
    %c0_9 = arith.constant 0 : index
    %c0_10 = arith.constant 0 : index
    %8 = vector.load %arg7[%c0_8, %c0_9, %c0_10] : memref<10x10x64xf32, #tpu.memory_space<vmem>>, vector<8x8x64xf32>
    %9 = vector.shape_cast %8 : vector<8x8x64xf32> to vector<64x64xf32>
    %10 = arith.truncf %9 : vector<64x64xf32> to vector<64x64xbf16>
    %c0_11 = arith.constant 0 : index
    %c0_12 = arith.constant 0 : index
    %c0_13 = arith.constant 0 : index
    %11 = vector.load %arg2[%c0_11, %c0_12, %c0_13] : memref<9x64x64xbf16, #tpu.memory_space<vmem>>, vector<1x64x64xbf16>
    %12 = vector.shape_cast %11 : vector<1x64x64xbf16> to vector<64x64xbf16>
    %cst_14 = arith.constant dense<0.000000e+00> : vector<64x64xf32>
    %13 = tpu.matmul %10, %12, %cst_14 {dimension_numbers = #tpu.dot_dimension_numbers<[1], [0], [0], [1], [0, 0, 1, 1], [], []>} : vector<64x64xbf16>, vector<64x64xbf16>, vector<64x64xf32> -> vector<64x64xf32>
    %14 = arith.addf %7, %13 : vector<64x64xf32>
    %c0_15 = arith.constant 0 : index
    %c1_16 = arith.constant 1 : index
    %c0_17 = arith.constant 0 : index
    %15 = vector.load %arg7[%c0_15, %c1_16, %c0_17] : memref<10x10x64xf32, #tpu.memory_space<vmem>>, vector<8x8x64xf32>
    %16 = vector.shape_cast %15 : vector<8x8x64xf32> to vector<64x64xf32>
    %17 = arith.truncf %16 : vector<64x64xf32> to vector<64x64xbf16>
    %c1_18 = arith.constant 1 : index
    %c0_19 = arith.constant 0 : index
    %c0_20 = arith.constant 0 : index
    %18 = vector.load %arg2[%c1_18, %c0_19, %c0_20] : memref<9x64x64xbf16, #tpu.memory_space<vmem>>, vector<1x64x64xbf16>
    %19 = vector.shape_cast %18 : vector<1x64x64xbf16> to vector<64x64xbf16>
    %cst_21 = arith.constant dense<0.000000e+00> : vector<64x64xf32>
    %20 = tpu.matmul %17, %19, %cst_21 {dimension_numbers = #tpu.dot_dimension_numbers<[1], [0], [0], [1], [0, 0, 1, 1], [], []>} : vector<64x64xbf16>, vector<64x64xbf16>, vector<64x64xf32> -> vector<64x64xf32>
    %21 = arith.addf %14, %20 : vector<64x64xf32>
    %c0_22 = arith.constant 0 : index
    %c2 = arith.constant 2 : index
    %c0_23 = arith.constant 0 : index
    %22 = vector.load %arg7[%c0_22, %c2, %c0_23] : memref<10x10x64xf32, #tpu.memory_space<vmem>>, vector<8x8x64xf32>
    %23 = vector.shape_cast %22 : vector<8x8x64xf32> to vector<64x64xf32>
    %24 = arith.truncf %23 : vector<64x64xf32> to vector<64x64xbf16>
    %c2_24 = arith.constant 2 : index
    %c0_25 = arith.constant 0 : index
    %c0_26 = arith.constant 0 : index
    %25 = vector.load %arg2[%c2_24, %c0_25, %c0_26] : memref<9x64x64xbf16, #tpu.memory_space<vmem>>, vector<1x64x64xbf16>
    %26 = vector.shape_cast %25 : vector<1x64x64xbf16> to vector<64x64xbf16>
    %cst_27 = arith.constant dense<0.000000e+00> : vector<64x64xf32>
    %27 = tpu.matmul %24, %26, %cst_27 {dimension_numbers = #tpu.dot_dimension_numbers<[1], [0], [0], [1], [0, 0, 1, 1], [], []>} : vector<64x64xbf16>, vector<64x64xbf16>, vector<64x64xf32> -> vector<64x64xf32>
    %28 = arith.addf %21, %27 : vector<64x64xf32>
    %c1_28 = arith.constant 1 : index
    %c0_29 = arith.constant 0 : index
    %c0_30 = arith.constant 0 : index
    %29 = vector.load %arg7[%c1_28, %c0_29, %c0_30] : memref<10x10x64xf32, #tpu.memory_space<vmem>>, vector<8x8x64xf32>
    %30 = vector.shape_cast %29 : vector<8x8x64xf32> to vector<64x64xf32>
    %31 = arith.truncf %30 : vector<64x64xf32> to vector<64x64xbf16>
    %c3 = arith.constant 3 : index
    %c0_31 = arith.constant 0 : index
    %c0_32 = arith.constant 0 : index
    %32 = vector.load %arg2[%c3, %c0_31, %c0_32] : memref<9x64x64xbf16, #tpu.memory_space<vmem>>, vector<1x64x64xbf16>
    %33 = vector.shape_cast %32 : vector<1x64x64xbf16> to vector<64x64xbf16>
    %cst_33 = arith.constant dense<0.000000e+00> : vector<64x64xf32>
    %34 = tpu.matmul %31, %33, %cst_33 {dimension_numbers = #tpu.dot_dimension_numbers<[1], [0], [0], [1], [0, 0, 1, 1], [], []>} : vector<64x64xbf16>, vector<64x64xbf16>, vector<64x64xf32> -> vector<64x64xf32>
    %35 = arith.addf %28, %34 : vector<64x64xf32>
    %c1_34 = arith.constant 1 : index
    %c1_35 = arith.constant 1 : index
    %c0_36 = arith.constant 0 : index
    %36 = vector.load %arg7[%c1_34, %c1_35, %c0_36] : memref<10x10x64xf32, #tpu.memory_space<vmem>>, vector<8x8x64xf32>
    %37 = vector.shape_cast %36 : vector<8x8x64xf32> to vector<64x64xf32>
    %38 = arith.truncf %37 : vector<64x64xf32> to vector<64x64xbf16>
    %c4 = arith.constant 4 : index
    %c0_37 = arith.constant 0 : index
    %c0_38 = arith.constant 0 : index
    %39 = vector.load %arg2[%c4, %c0_37, %c0_38] : memref<9x64x64xbf16, #tpu.memory_space<vmem>>, vector<1x64x64xbf16>
    %40 = vector.shape_cast %39 : vector<1x64x64xbf16> to vector<64x64xbf16>
    %cst_39 = arith.constant dense<0.000000e+00> : vector<64x64xf32>
    %41 = tpu.matmul %38, %40, %cst_39 {dimension_numbers = #tpu.dot_dimension_numbers<[1], [0], [0], [1], [0, 0, 1, 1], [], []>} : vector<64x64xbf16>, vector<64x64xbf16>, vector<64x64xf32> -> vector<64x64xf32>
    %42 = arith.addf %35, %41 : vector<64x64xf32>
    %c1_40 = arith.constant 1 : index
    %c2_41 = arith.constant 2 : index
    %c0_42 = arith.constant 0 : index
    %43 = vector.load %arg7[%c1_40, %c2_41, %c0_42] : memref<10x10x64xf32, #tpu.memory_space<vmem>>, vector<8x8x64xf32>
    %44 = vector.shape_cast %43 : vector<8x8x64xf32> to vector<64x64xf32>
    %45 = arith.truncf %44 : vector<64x64xf32> to vector<64x64xbf16>
    %c5 = arith.constant 5 : index
    %c0_43 = arith.constant 0 : index
    %c0_44 = arith.constant 0 : index
    %46 = vector.load %arg2[%c5, %c0_43, %c0_44] : memref<9x64x64xbf16, #tpu.memory_space<vmem>>, vector<1x64x64xbf16>
    %47 = vector.shape_cast %46 : vector<1x64x64xbf16> to vector<64x64xbf16>
    %cst_45 = arith.constant dense<0.000000e+00> : vector<64x64xf32>
    %48 = tpu.matmul %45, %47, %cst_45 {dimension_numbers = #tpu.dot_dimension_numbers<[1], [0], [0], [1], [0, 0, 1, 1], [], []>} : vector<64x64xbf16>, vector<64x64xbf16>, vector<64x64xf32> -> vector<64x64xf32>
    %49 = arith.addf %42, %48 : vector<64x64xf32>
    %c2_46 = arith.constant 2 : index
    %c0_47 = arith.constant 0 : index
    %c0_48 = arith.constant 0 : index
    %50 = vector.load %arg7[%c2_46, %c0_47, %c0_48] : memref<10x10x64xf32, #tpu.memory_space<vmem>>, vector<8x8x64xf32>
    %51 = vector.shape_cast %50 : vector<8x8x64xf32> to vector<64x64xf32>
    %52 = arith.truncf %51 : vector<64x64xf32> to vector<64x64xbf16>
    %c6 = arith.constant 6 : index
    %c0_49 = arith.constant 0 : index
    %c0_50 = arith.constant 0 : index
    %53 = vector.load %arg2[%c6, %c0_49, %c0_50] : memref<9x64x64xbf16, #tpu.memory_space<vmem>>, vector<1x64x64xbf16>
    %54 = vector.shape_cast %53 : vector<1x64x64xbf16> to vector<64x64xbf16>
    %cst_51 = arith.constant dense<0.000000e+00> : vector<64x64xf32>
    %55 = tpu.matmul %52, %54, %cst_51 {dimension_numbers = #tpu.dot_dimension_numbers<[1], [0], [0], [1], [0, 0, 1, 1], [], []>} : vector<64x64xbf16>, vector<64x64xbf16>, vector<64x64xf32> -> vector<64x64xf32>
    %56 = arith.addf %49, %55 : vector<64x64xf32>
    %c2_52 = arith.constant 2 : index
    %c1_53 = arith.constant 1 : index
    %c0_54 = arith.constant 0 : index
    %57 = vector.load %arg7[%c2_52, %c1_53, %c0_54] : memref<10x10x64xf32, #tpu.memory_space<vmem>>, vector<8x8x64xf32>
    %58 = vector.shape_cast %57 : vector<8x8x64xf32> to vector<64x64xf32>
    %59 = arith.truncf %58 : vector<64x64xf32> to vector<64x64xbf16>
    %c7 = arith.constant 7 : index
    %c0_55 = arith.constant 0 : index
    %c0_56 = arith.constant 0 : index
    %60 = vector.load %arg2[%c7, %c0_55, %c0_56] : memref<9x64x64xbf16, #tpu.memory_space<vmem>>, vector<1x64x64xbf16>
    %61 = vector.shape_cast %60 : vector<1x64x64xbf16> to vector<64x64xbf16>
    %cst_57 = arith.constant dense<0.000000e+00> : vector<64x64xf32>
    %62 = tpu.matmul %59, %61, %cst_57 {dimension_numbers = #tpu.dot_dimension_numbers<[1], [0], [0], [1], [0, 0, 1, 1], [], []>} : vector<64x64xbf16>, vector<64x64xbf16>, vector<64x64xf32> -> vector<64x64xf32>
    %63 = arith.addf %56, %62 : vector<64x64xf32>
    %c2_58 = arith.constant 2 : index
    %c2_59 = arith.constant 2 : index
    %c0_60 = arith.constant 0 : index
    %64 = vector.load %arg7[%c2_58, %c2_59, %c0_60] : memref<10x10x64xf32, #tpu.memory_space<vmem>>, vector<8x8x64xf32>
    %65 = vector.shape_cast %64 : vector<8x8x64xf32> to vector<64x64xf32>
    %66 = arith.truncf %65 : vector<64x64xf32> to vector<64x64xbf16>
    %c8 = arith.constant 8 : index
    %c0_61 = arith.constant 0 : index
    %c0_62 = arith.constant 0 : index
    %67 = vector.load %arg2[%c8, %c0_61, %c0_62] : memref<9x64x64xbf16, #tpu.memory_space<vmem>>, vector<1x64x64xbf16>
    %68 = vector.shape_cast %67 : vector<1x64x64xbf16> to vector<64x64xbf16>
    %cst_63 = arith.constant dense<0.000000e+00> : vector<64x64xf32>
    %69 = tpu.matmul %66, %68, %cst_63 {dimension_numbers = #tpu.dot_dimension_numbers<[1], [0], [0], [1], [0, 0, 1, 1], [], []>} : vector<64x64xbf16>, vector<64x64xbf16>, vector<64x64xf32> -> vector<64x64xf32>
    %70 = arith.addf %63, %69 : vector<64x64xf32>
    %c0_64 = arith.constant 0 : index
    %c0_65 = arith.constant 0 : index
    %71 = vector.load %arg3[%c0_64, %c0_65] : memref<1x64xf32, #tpu.memory_space<vmem>>, vector<1x64xf32>
    %72 = vector.broadcast %71 : vector<1x64xf32> to vector<64x64xf32>
    %73 = arith.addf %70, %72 : vector<64x64xf32>
    %cst_66 = arith.constant 0.000000e+00 : f32
    %74 = vector.broadcast %cst_66 : f32 to vector<64x64xf32>
    %75 = arith.maximumf %73, %74 : vector<64x64xf32>
    %cst_67 = arith.constant 0.000000e+00 : f32
    %76 = vector.broadcast %cst_67 : f32 to vector<10x10x64xf32>
    %c0_68 = arith.constant 0 : index
    %c0_69 = arith.constant 0 : index
    %c0_70 = arith.constant 0 : index
    %77 = vector.load %arg8[%c0_68, %c0_69, %c0_70] : memref<10x10x64xf32, #tpu.memory_space<vmem>>, vector<10x10x64xf32>
    tpu.vector_store %arg8[%c0_68, %c0_69, %c0_70], %76 {strides = array<i32>} : memref<10x10x64xf32, #tpu.memory_space<vmem>>, vector<10x10x64xf32>,
    %78 = vector.shape_cast %75 : vector<64x64xf32> to vector<8x8x64xf32>
    %c1_71 = arith.constant 1 : index
    %c1_72 = arith.constant 1 : index
    %c0_73 = arith.constant 0 : index
    %79 = vector.load %arg8[%c1_71, %c1_72, %c0_73] : memref<10x10x64xf32, #tpu.memory_space<vmem>>, vector<8x8x64xf32>
    tpu.vector_store %arg8[%c1_71, %c1_72, %c0_73], %78 {strides = array<i32>} : memref<10x10x64xf32, #tpu.memory_space<vmem>>, vector<8x8x64xf32>,
    %cst_74 = arith.constant 0.000000e+00 : f32
    %80 = vector.broadcast %cst_74 : f32 to vector<64x64xf32>
    %c0_75 = arith.constant 0 : index
    %c0_76 = arith.constant 0 : index
    %c0_77 = arith.constant 0 : index
    %81 = vector.load %arg8[%c0_75, %c0_76, %c0_77] : memref<10x10x64xf32, #tpu.memory_space<vmem>>, vector<8x8x64xf32>
    %82 = vector.shape_cast %81 : vector<8x8x64xf32> to vector<64x64xf32>
    %83 = arith.truncf %82 : vector<64x64xf32> to vector<64x64xbf16>
    %c0_78 = arith.constant 0 : index
    %c0_79 = arith.constant 0 : index
    %c0_80 = arith.constant 0 : index
    %84 = vector.load %arg4[%c0_78, %c0_79, %c0_80] : memref<9x64x64xbf16, #tpu.memory_space<vmem>>, vector<1x64x64xbf16>
    %85 = vector.shape_cast %84 : vector<1x64x64xbf16> to vector<64x64xbf16>
    %cst_81 = arith.constant dense<0.000000e+00> : vector<64x64xf32>
    %86 = tpu.matmul %83, %85, %cst_81 {dimension_numbers = #tpu.dot_dimension_numbers<[1], [0], [0], [1], [0, 0, 1, 1], [], []>} : vector<64x64xbf16>, vector<64x64xbf16>, vector<64x64xf32> -> vector<64x64xf32>
    %87 = arith.addf %80, %86 : vector<64x64xf32>
    %c0_82 = arith.constant 0 : index
    %c1_83 = arith.constant 1 : index
    %c0_84 = arith.constant 0 : index
    %88 = vector.load %arg8[%c0_82, %c1_83, %c0_84] : memref<10x10x64xf32, #tpu.memory_space<vmem>>, vector<8x8x64xf32>
    %89 = vector.shape_cast %88 : vector<8x8x64xf32> to vector<64x64xf32>
    %90 = arith.truncf %89 : vector<64x64xf32> to vector<64x64xbf16>
    %c1_85 = arith.constant 1 : index
    %c0_86 = arith.constant 0 : index
    %c0_87 = arith.constant 0 : index
    %91 = vector.load %arg4[%c1_85, %c0_86, %c0_87] : memref<9x64x64xbf16, #tpu.memory_space<vmem>>, vector<1x64x64xbf16>
    %92 = vector.shape_cast %91 : vector<1x64x64xbf16> to vector<64x64xbf16>
    %cst_88 = arith.constant dense<0.000000e+00> : vector<64x64xf32>
    %93 = tpu.matmul %90, %92, %cst_88 {dimension_numbers = #tpu.dot_dimension_numbers<[1], [0], [0], [1], [0, 0, 1, 1], [], []>} : vector<64x64xbf16>, vector<64x64xbf16>, vector<64x64xf32> -> vector<64x64xf32>
    %94 = arith.addf %87, %93 : vector<64x64xf32>
    %c0_89 = arith.constant 0 : index
    %c2_90 = arith.constant 2 : index
    %c0_91 = arith.constant 0 : index
    %95 = vector.load %arg8[%c0_89, %c2_90, %c0_91] : memref<10x10x64xf32, #tpu.memory_space<vmem>>, vector<8x8x64xf32>
    %96 = vector.shape_cast %95 : vector<8x8x64xf32> to vector<64x64xf32>
    %97 = arith.truncf %96 : vector<64x64xf32> to vector<64x64xbf16>
    %c2_92 = arith.constant 2 : index
    %c0_93 = arith.constant 0 : index
    %c0_94 = arith.constant 0 : index
    %98 = vector.load %arg4[%c2_92, %c0_93, %c0_94] : memref<9x64x64xbf16, #tpu.memory_space<vmem>>, vector<1x64x64xbf16>
    %99 = vector.shape_cast %98 : vector<1x64x64xbf16> to vector<64x64xbf16>
    %cst_95 = arith.constant dense<0.000000e+00> : vector<64x64xf32>
    %100 = tpu.matmul %97, %99, %cst_95 {dimension_numbers = #tpu.dot_dimension_numbers<[1], [0], [0], [1], [0, 0, 1, 1], [], []>} : vector<64x64xbf16>, vector<64x64xbf16>, vector<64x64xf32> -> vector<64x64xf32>
    %101 = arith.addf %94, %100 : vector<64x64xf32>
    %c1_96 = arith.constant 1 : index
    %c0_97 = arith.constant 0 : index
    %c0_98 = arith.constant 0 : index
    %102 = vector.load %arg8[%c1_96, %c0_97, %c0_98] : memref<10x10x64xf32, #tpu.memory_space<vmem>>, vector<8x8x64xf32>
    %103 = vector.shape_cast %102 : vector<8x8x64xf32> to vector<64x64xf32>
    %104 = arith.truncf %103 : vector<64x64xf32> to vector<64x64xbf16>
    %c3_99 = arith.constant 3 : index
    %c0_100 = arith.constant 0 : index
    %c0_101 = arith.constant 0 : index
    %105 = vector.load %arg4[%c3_99, %c0_100, %c0_101] : memref<9x64x64xbf16, #tpu.memory_space<vmem>>, vector<1x64x64xbf16>
    %106 = vector.shape_cast %105 : vector<1x64x64xbf16> to vector<64x64xbf16>
    %cst_102 = arith.constant dense<0.000000e+00> : vector<64x64xf32>
    %107 = tpu.matmul %104, %106, %cst_102 {dimension_numbers = #tpu.dot_dimension_numbers<[1], [0], [0], [1], [0, 0, 1, 1], [], []>} : vector<64x64xbf16>, vector<64x64xbf16>, vector<64x64xf32> -> vector<64x64xf32>
    %108 = arith.addf %101, %107 : vector<64x64xf32>
    %c1_103 = arith.constant 1 : index
    %c1_104 = arith.constant 1 : index
    %c0_105 = arith.constant 0 : index
    %109 = vector.load %arg8[%c1_103, %c1_104, %c0_105] : memref<10x10x64xf32, #tpu.memory_space<vmem>>, vector<8x8x64xf32>
    %110 = vector.shape_cast %109 : vector<8x8x64xf32> to vector<64x64xf32>
    %111 = arith.truncf %110 : vector<64x64xf32> to vector<64x64xbf16>
    %c4_106 = arith.constant 4 : index
    %c0_107 = arith.constant 0 : index
    %c0_108 = arith.constant 0 : index
    %112 = vector.load %arg4[%c4_106, %c0_107, %c0_108] : memref<9x64x64xbf16, #tpu.memory_space<vmem>>, vector<1x64x64xbf16>
    %113 = vector.shape_cast %112 : vector<1x64x64xbf16> to vector<64x64xbf16>
    %cst_109 = arith.constant dense<0.000000e+00> : vector<64x64xf32>
    %114 = tpu.matmul %111, %113, %cst_109 {dimension_numbers = #tpu.dot_dimension_numbers<[1], [0], [0], [1], [0, 0, 1, 1], [], []>} : vector<64x64xbf16>, vector<64x64xbf16>, vector<64x64xf32> -> vector<64x64xf32>
    %115 = arith.addf %108, %114 : vector<64x64xf32>
    %c1_110 = arith.constant 1 : index
    %c2_111 = arith.constant 2 : index
    %c0_112 = arith.constant 0 : index
    %116 = vector.load %arg8[%c1_110, %c2_111, %c0_112] : memref<10x10x64xf32, #tpu.memory_space<vmem>>, vector<8x8x64xf32>
    %117 = vector.shape_cast %116 : vector<8x8x64xf32> to vector<64x64xf32>
    %118 = arith.truncf %117 : vector<64x64xf32> to vector<64x64xbf16>
    %c5_113 = arith.constant 5 : index
    %c0_114 = arith.constant 0 : index
    %c0_115 = arith.constant 0 : index
    %119 = vector.load %arg4[%c5_113, %c0_114, %c0_115] : memref<9x64x64xbf16, #tpu.memory_space<vmem>>, vector<1x64x64xbf16>
    %120 = vector.shape_cast %119 : vector<1x64x64xbf16> to vector<64x64xbf16>
    %cst_116 = arith.constant dense<0.000000e+00> : vector<64x64xf32>
    %121 = tpu.matmul %118, %120, %cst_116 {dimension_numbers = #tpu.dot_dimension_numbers<[1], [0], [0], [1], [0, 0, 1, 1], [], []>} : vector<64x64xbf16>, vector<64x64xbf16>, vector<64x64xf32> -> vector<64x64xf32>
    %122 = arith.addf %115, %121 : vector<64x64xf32>
    %c2_117 = arith.constant 2 : index
    %c0_118 = arith.constant 0 : index
    %c0_119 = arith.constant 0 : index
    %123 = vector.load %arg8[%c2_117, %c0_118, %c0_119] : memref<10x10x64xf32, #tpu.memory_space<vmem>>, vector<8x8x64xf32>
    %124 = vector.shape_cast %123 : vector<8x8x64xf32> to vector<64x64xf32>
    %125 = arith.truncf %124 : vector<64x64xf32> to vector<64x64xbf16>
    %c6_120 = arith.constant 6 : index
    %c0_121 = arith.constant 0 : index
    %c0_122 = arith.constant 0 : index
    %126 = vector.load %arg4[%c6_120, %c0_121, %c0_122] : memref<9x64x64xbf16, #tpu.memory_space<vmem>>, vector<1x64x64xbf16>
    %127 = vector.shape_cast %126 : vector<1x64x64xbf16> to vector<64x64xbf16>
    %cst_123 = arith.constant dense<0.000000e+00> : vector<64x64xf32>
    %128 = tpu.matmul %125, %127, %cst_123 {dimension_numbers = #tpu.dot_dimension_numbers<[1], [0], [0], [1], [0, 0, 1, 1], [], []>} : vector<64x64xbf16>, vector<64x64xbf16>, vector<64x64xf32> -> vector<64x64xf32>
    %129 = arith.addf %122, %128 : vector<64x64xf32>
    %c2_124 = arith.constant 2 : index
    %c1_125 = arith.constant 1 : index
    %c0_126 = arith.constant 0 : index
    %130 = vector.load %arg8[%c2_124, %c1_125, %c0_126] : memref<10x10x64xf32, #tpu.memory_space<vmem>>, vector<8x8x64xf32>
    %131 = vector.shape_cast %130 : vector<8x8x64xf32> to vector<64x64xf32>
    %132 = arith.truncf %131 : vector<64x64xf32> to vector<64x64xbf16>
    %c7_127 = arith.constant 7 : index
    %c0_128 = arith.constant 0 : index
    %c0_129 = arith.constant 0 : index
    %133 = vector.load %arg4[%c7_127, %c0_128, %c0_129] : memref<9x64x64xbf16, #tpu.memory_space<vmem>>, vector<1x64x64xbf16>
    %134 = vector.shape_cast %133 : vector<1x64x64xbf16> to vector<64x64xbf16>
    %cst_130 = arith.constant dense<0.000000e+00> : vector<64x64xf32>
    %135 = tpu.matmul %132, %134, %cst_130 {dimension_numbers = #tpu.dot_dimension_numbers<[1], [0], [0], [1], [0, 0, 1, 1], [], []>} : vector<64x64xbf16>, vector<64x64xbf16>, vector<64x64xf32> -> vector<64x64xf32>
    %136 = arith.addf %129, %135 : vector<64x64xf32>
    %c2_131 = arith.constant 2 : index
    %c2_132 = arith.constant 2 : index
    %c0_133 = arith.constant 0 : index
    %137 = vector.load %arg8[%c2_131, %c2_132, %c0_133] : memref<10x10x64xf32, #tpu.memory_space<vmem>>, vector<8x8x64xf32>
    %138 = vector.shape_cast %137 : vector<8x8x64xf32> to vector<64x64xf32>
    %139 = arith.truncf %138 : vector<64x64xf32> to vector<64x64xbf16>
    %c8_134 = arith.constant 8 : index
    %c0_135 = arith.constant 0 : index
    %c0_136 = arith.constant 0 : index
    %140 = vector.load %arg4[%c8_134, %c0_135, %c0_136] : memref<9x64x64xbf16, #tpu.memory_space<vmem>>, vector<1x64x64xbf16>
    %141 = vector.shape_cast %140 : vector<1x64x64xbf16> to vector<64x64xbf16>
    %cst_137 = arith.constant dense<0.000000e+00> : vector<64x64xf32>
    %142 = tpu.matmul %139, %141, %cst_137 {dimension_numbers = #tpu.dot_dimension_numbers<[1], [0], [0], [1], [0, 0, 1, 1], [], []>} : vector<64x64xbf16>, vector<64x64xbf16>, vector<64x64xf32> -> vector<64x64xf32>
    %143 = arith.addf %136, %142 : vector<64x64xf32>
    %c0_138 = arith.constant 0 : index
    %c0_139 = arith.constant 0 : index
    %144 = vector.load %arg5[%c0_138, %c0_139] : memref<1x64xf32, #tpu.memory_space<vmem>>, vector<1x64xf32>
    %145 = vector.broadcast %144 : vector<1x64xf32> to vector<64x64xf32>
    %146 = arith.addf %143, %145 : vector<64x64xf32>
    %147 = arith.extf %1 : vector<64x64xbf16> to vector<64x64xf32>
    %148 = arith.addf %146, %147 : vector<64x64xf32>
    %cst_140 = arith.constant 0.000000e+00 : f32
    %149 = vector.broadcast %cst_140 : f32 to vector<64x64xf32>
    %150 = arith.maximumf %148, %149 : vector<64x64xf32>
    %151 = arith.truncf %150 : vector<64x64xf32> to vector<64x64xbf16>
    %c0_141 = arith.constant 0 : index
    %c0_142 = arith.constant 0 : index
    %c0_143 = arith.constant 0 : index
    %152 = vector.load %arg6[%c0_141, %c0_142, %c0_143] : memref<1x64x64xbf16, #tpu.memory_space<vmem>>, vector<1x64x64xbf16>
    %153 = vector.shape_cast %152 : vector<1x64x64xbf16> to vector<64x64xbf16>
    %154 = vector.shape_cast %151 : vector<64x64xbf16> to vector<1x64x64xbf16>
    tpu.vector_store %arg6[%c0_141, %c0_142, %c0_143], %154 {strides = array<i32>} : memref<1x64x64xbf16, #tpu.memory_space<vmem>>, vector<1x64x64xbf16>,
    return
  }
  func.func @transform_0(%arg0: i32) -> (i32, i32, i32) {
    %c0_i32 = arith.constant 0 : i32
    %c0_i32_0 = arith.constant 0 : i32
    %c0_i32_1 = arith.constant 0 : i32
    return %arg0, %c0_i32, %c0_i32_0 : i32, i32, i32
  }
  func.func @transform_1(%arg0: i32) -> (i32, i32, i32) {
    %c0_i32 = arith.constant 0 : i32
    %c0_i32_0 = arith.constant 0 : i32
    %c0_i32_1 = arith.constant 0 : i32
    %c0_i32_2 = arith.constant 0 : i32
    return %c0_i32, %c0_i32_0, %c0_i32_1 : i32, i32, i32
  }
  func.func @transform_2(%arg0: i32) -> (i32, i32) {
    %c0_i32 = arith.constant 0 : i32
    %c0_i32_0 = arith.constant 0 : i32
    %c0_i32_1 = arith.constant 0 : i32
    return %c0_i32, %c0_i32_0 : i32, i32
  }
  func.func @transform_3(%arg0: i32) -> (i32, i32, i32) {
    %c0_i32 = arith.constant 0 : i32
    %c0_i32_0 = arith.constant 0 : i32
    %c0_i32_1 = arith.constant 0 : i32
    %c0_i32_2 = arith.constant 0 : i32
    return %c0_i32, %c0_i32_0, %c0_i32_1 : i32, i32, i32
  }
  func.func @transform_4(%arg0: i32) -> (i32, i32) {
    %c0_i32 = arith.constant 0 : i32
    %c0_i32_0 = arith.constant 0 : i32
    %c0_i32_1 = arith.constant 0 : i32
    return %c0_i32, %c0_i32_0 : i32, i32
  }
  func.func @transform_5(%arg0: i32) -> (i32, i32, i32) {
    %c0_i32 = arith.constant 0 : i32
    %c0_i32_0 = arith.constant 0 : i32
    %c0_i32_1 = arith.constant 0 : i32
    return %arg0, %c0_i32, %c0_i32_0 : i32, i32, i32
  }
}

module attributes {stable_mosaic.version = 11 : i64} {
  func.func @kernel(%arg0: i32, %arg1: memref<1x64x64xbf16, #tpu.memory_space<vmem>>, %arg2: memref<64x16xbf16, #tpu.memory_space<vmem>>, %arg3: memref<1x16xf32, #tpu.memory_space<vmem>>, %arg4: memref<64x10xf32, #tpu.memory_space<vmem>>, %arg5: memref<16x10xf32, #tpu.memory_space<vmem>>, %arg6: memref<1x10xf32, #tpu.memory_space<vmem>>, %arg7: memref<1x1x10xf32, #tpu.memory_space<vmem>>) attributes {dimension_semantics = [#tpu.dimension_semantics<parallel>], iteration_bounds = array<i64: 2>, scalar_prefetch = 0 : i64, scratch_operands = 0 : i64, tpu.core_type = #tpu.core_type<tc>, window_params = [{transform_indices = @transform_0, window_bounds = array<i64: 1, 64, 64>}, {pipeline_mode = #tpu.pipeline_mode<synchronous>, transform_indices = @transform_1, window_bounds = array<i64: 64, 16>}, {pipeline_mode = #tpu.pipeline_mode<synchronous>, transform_indices = @transform_2, window_bounds = array<i64: 1, 16>}, {pipeline_mode = #tpu.pipeline_mode<synchronous>, transform_indices = @transform_3, window_bounds = array<i64: 64, 10>}, {pipeline_mode = #tpu.pipeline_mode<synchronous>, transform_indices = @transform_4, window_bounds = array<i64: 16, 10>}, {pipeline_mode = #tpu.pipeline_mode<synchronous>, transform_indices = @transform_5, window_bounds = array<i64: 1, 10>}, {transform_indices = @transform_6, window_bounds = array<i64: 1, 1, 10>}]} {
    %c0 = arith.constant 0 : index
    %c0_0 = arith.constant 0 : index
    %c0_1 = arith.constant 0 : index
    %0 = vector.load %arg1[%c0, %c0_0, %c0_1] : memref<1x64x64xbf16, #tpu.memory_space<vmem>>, vector<1x64x64xbf16>
    %1 = vector.shape_cast %0 : vector<1x64x64xbf16> to vector<64x64xbf16>
    %c0_2 = arith.constant 0 : index
    %c0_3 = arith.constant 0 : index
    %2 = vector.load %arg2[%c0_2, %c0_3] : memref<64x16xbf16, #tpu.memory_space<vmem>>, vector<64x16xbf16>
    %cst = arith.constant dense<0.000000e+00> : vector<64x16xf32>
    %3 = tpu.matmul %1, %2, %cst {dimension_numbers = #tpu.dot_dimension_numbers<[1], [0], [0], [1], [0, 0, 1, 1], [], []>} : vector<64x64xbf16>, vector<64x16xbf16>, vector<64x16xf32> -> vector<64x16xf32>
    %c0_4 = arith.constant 0 : index
    %c0_5 = arith.constant 0 : index
    %4 = vector.load %arg3[%c0_4, %c0_5] : memref<1x16xf32, #tpu.memory_space<vmem>>, vector<1x16xf32>
    %5 = vector.broadcast %4 : vector<1x16xf32> to vector<64x16xf32>
    %6 = arith.addf %3, %5 : vector<64x16xf32>
    %7 = arith.negf %6 : vector<64x16xf32>
    %8 = math.exp %7 : vector<64x16xf32>
    %cst_6 = arith.constant 1.000000e+00 : f32
    %9 = vector.broadcast %cst_6 : f32 to vector<64x16xf32>
    %10 = arith.addf %9, %8 : vector<64x16xf32>
    %11 = arith.divf %9, %10 : vector<64x16xf32>
    %12 = arith.extf %1 : vector<64x64xbf16> to vector<64x64xf32>
    %cst_7 = arith.constant dense<0.000000e+00> : vector<64xf32>
    %13 = vector.multi_reduction <add>, %12, %cst_7 [0] : vector<64x64xf32> to vector<64xf32>
    %14 = vector.shape_cast %13 : vector<64xf32> to vector<1x64xf32>
    %cst_8 = arith.constant 1.562500e-02 : f32
    %15 = vector.broadcast %cst_8 : f32 to vector<1x64xf32>
    %16 = arith.mulf %14, %15 : vector<1x64xf32>
    %cst_9 = arith.constant dense<0.000000e+00> : vector<16xf32>
    %17 = vector.multi_reduction <add>, %11, %cst_9 [0] : vector<64x16xf32> to vector<16xf32>
    %18 = vector.shape_cast %17 : vector<16xf32> to vector<1x16xf32>
    %cst_10 = arith.constant 1.562500e-02 : f32
    %19 = vector.broadcast %cst_10 : f32 to vector<1x16xf32>
    %20 = arith.mulf %18, %19 : vector<1x16xf32>
    %c0_11 = arith.constant 0 : index
    %c0_12 = arith.constant 0 : index
    %21 = vector.load %arg4[%c0_11, %c0_12] : memref<64x10xf32, #tpu.memory_space<vmem>>, vector<64x10xf32>
    %cst_13 = arith.constant dense<0.000000e+00> : vector<1x10xf32>
    %22 = tpu.matmul %16, %21, %cst_13 {dimension_numbers = #tpu.dot_dimension_numbers<[1], [0], [0], [1], [0, 0, 1, 1], [], []>} : vector<1x64xf32>, vector<64x10xf32>, vector<1x10xf32> -> vector<1x10xf32>
    %c0_14 = arith.constant 0 : index
    %c0_15 = arith.constant 0 : index
    %23 = vector.load %arg5[%c0_14, %c0_15] : memref<16x10xf32, #tpu.memory_space<vmem>>, vector<16x10xf32>
    %cst_16 = arith.constant dense<0.000000e+00> : vector<1x10xf32>
    %24 = tpu.matmul %20, %23, %cst_16 {dimension_numbers = #tpu.dot_dimension_numbers<[1], [0], [0], [1], [0, 0, 1, 1], [], []>} : vector<1x16xf32>, vector<16x10xf32>, vector<1x10xf32> -> vector<1x10xf32>
    %25 = arith.addf %22, %24 : vector<1x10xf32>
    %c0_17 = arith.constant 0 : index
    %c0_18 = arith.constant 0 : index
    %26 = vector.load %arg6[%c0_17, %c0_18] : memref<1x10xf32, #tpu.memory_space<vmem>>, vector<1x10xf32>
    %27 = arith.addf %25, %26 : vector<1x10xf32>
    %c0_19 = arith.constant 0 : index
    %c0_20 = arith.constant 0 : index
    %c0_21 = arith.constant 0 : index
    %28 = vector.load %arg7[%c0_19, %c0_20, %c0_21] : memref<1x1x10xf32, #tpu.memory_space<vmem>>, vector<1x1x10xf32>
    %29 = vector.shape_cast %28 : vector<1x1x10xf32> to vector<1x10xf32>
    %30 = vector.shape_cast %27 : vector<1x10xf32> to vector<1x1x10xf32>
    tpu.vector_store %arg7[%c0_19, %c0_20, %c0_21], %30 {strides = array<i32>} : memref<1x1x10xf32, #tpu.memory_space<vmem>>, vector<1x1x10xf32>,
    return
  }
  func.func @transform_0(%arg0: i32) -> (i32, i32, i32) {
    %c0_i32 = arith.constant 0 : i32
    %c0_i32_0 = arith.constant 0 : i32
    %c0_i32_1 = arith.constant 0 : i32
    return %arg0, %c0_i32, %c0_i32_0 : i32, i32, i32
  }
  func.func @transform_1(%arg0: i32) -> (i32, i32) {
    %c0_i32 = arith.constant 0 : i32
    %c0_i32_0 = arith.constant 0 : i32
    %c0_i32_1 = arith.constant 0 : i32
    return %c0_i32, %c0_i32_0 : i32, i32
  }
  func.func @transform_2(%arg0: i32) -> (i32, i32) {
    %c0_i32 = arith.constant 0 : i32
    %c0_i32_0 = arith.constant 0 : i32
    %c0_i32_1 = arith.constant 0 : i32
    return %c0_i32, %c0_i32_0 : i32, i32
  }
  func.func @transform_3(%arg0: i32) -> (i32, i32) {
    %c0_i32 = arith.constant 0 : i32
    %c0_i32_0 = arith.constant 0 : i32
    %c0_i32_1 = arith.constant 0 : i32
    return %c0_i32, %c0_i32_0 : i32, i32
  }
  func.func @transform_4(%arg0: i32) -> (i32, i32) {
    %c0_i32 = arith.constant 0 : i32
    %c0_i32_0 = arith.constant 0 : i32
    %c0_i32_1 = arith.constant 0 : i32
    return %c0_i32, %c0_i32_0 : i32, i32
  }
  func.func @transform_5(%arg0: i32) -> (i32, i32) {
    %c0_i32 = arith.constant 0 : i32
    %c0_i32_0 = arith.constant 0 : i32
    %c0_i32_1 = arith.constant 0 : i32
    return %c0_i32, %c0_i32_0 : i32, i32
  }
  func.func @transform_6(%arg0: i32) -> (i32, i32, i32) {
    %c0_i32 = arith.constant 0 : i32
    %c0_i32_0 = arith.constant 0 : i32
    %c0_i32_1 = arith.constant 0 : i32
    return %arg0, %c0_i32, %c0_i32_0 : i32, i32, i32
  }
}

</mosaic_0001>

<bundles_post_ra>
// kernel: _lambda_.5
= control target key start
LH: loop header
LB: loop body
LE: loop exit
PB: predicated region body
PF: predicated region fallthrough
CT: control target
= control target key end

     0   :  { %s913_s21 = smov 0   ;;  %s1017_s0 = inlined_call_operand.vmem [shape: bf16[2,64,64], index: 0, kind: input, shape index: {}]   ;;  %s1018_s1 = inlined_call_operand.vmem [shape: bf16[64,16], index: 1, kind: input, shape index: {}]   ;;  %s1019_s2 = inlined_call_operand.vmem [shape: f32[1,16], index: 2, kind: input, shape index: {}]   ;;  %s1020_s3 = inlined_call_operand.vmem [shape: f32[64,10], index: 3, kind: input, shape index: {}]   ;;  %s1021_s4 = inlined_call_operand.vmem [shape: f32[16,10], index: 4, kind: input, shape index: {}]   ;;  %s1022_s5 = inlined_call_operand.vmem [shape: f32[1,10], index: 5, kind: input, shape index: {}]   ;;  %s1023_s6 = inlined_call_operand.vmem [shape: f32[2,1,10], index: 6, kind: output, shape index: {}]  }
   0x1 LB: > { %s702_s22 = sadd.s32 4294967295, %s873_s21   ;;  %p706_p0 = scmp.ge.s32.totalorder %s873_s21, 1  ;;  %s873_s21 = sphi %s913_s21, %s16_s21  }
   0x2   : > { %p212_p1 = scmp.lt.s32.totalorder %s873_s21, 3 }
   0x4   : > { %p213_p2 = pnand %p706_p0, %p212_p1 }
   0x5   : > { %v823_v0 = vld [vmem:[%s1018_s1] sm:$0xff] (!%p213_p2)   ;;  %p240_p3 = scmp.lt.s32.totalorder (!%p213_p2), %s702_s22, 1  ;;  %v824_v1 = vld [vmem:[%s1018_s1 + $0x8] sm:$0xff] (!%p213_p2)   ;;  %v825_v2 = vld [vmem:[%s1018_s1 + $0x10] sm:$0xff] (!%p213_p2)   ;;  %vm316_vm0 = vcmask (!%p213_p2), 523264   ;;  %v875_v33 = vmov (!%p213_p2), 0.0|0.0  }
   0x6   : > { %216 = sbr.rel (%p213_p2) target bundleno = 527 (0x20f), region = 44  ;;  %755 = vmatprep.subr.bf16.mxu0 (!%p213_p2), %v823_v0  ;;  %v826_v8 = vld [vmem:[%s1018_s1 + $0x18] sm:$0xff] (!%p213_p2)   ;;  %v503_v31 = vld [vmem:[%s1021_s4] sm:$0xff] (!%p213_p2)  ;;  %v504_v32 = vld [vmem:[%s1021_s4 + $0x8] sm:$0xff] (!%p213_p2)  ;;  %797 = vmatprep.subr.bf16.mxu1 (!%p213_p2), %v875_v33  ;;  %vm876_vm1 = vmmov (!%p213_p2), 0   ;;  %v877_v35 = vmov (!%p213_p2), 0.0  }
   0x7   : > { %756 = vmatpush3.bf16.msra.mxu0 (!%p213_p2), %v823_v0  ;;  %v798_v34 = vpack.c.bf16 (!%p213_p2), %v504_v32, %v503_v31  ;;  %775 = vmatprep.mubr.msk.f32.mxu1 (!%p213_p2), %vm876_vm1, %v877_v35  ;;  %v709_v36 = vld [vmem:[%s1019_s2] ss:$0 sm:$0xff] (!%p213_p2)  ;;  %vm472_vm2 = vcmask (!%p213_p2), 130048   ;;  %vm653_vm3 = vcmask (!%p213_p2), 73728  }
   0x8   : > { %757 = vmatprep.subr.bf16.mxu0 (!%p213_p2), %v824_v1 }
   0x9   : > { %799 = vmatpush3.bf16.msra.mxu1 (!%p213_p2), %v798_v34 }
   0xa   : > { %800 = vmatprep.subr.bf16.mxu1 (!%p213_p2), %v875_v33 }
   0xb   : > { %758 = vmatpush3.bf16.msra.mxu0 (!%p213_p2), %v824_v1 }
   0xc   : > { %759 = vmatprep.subr.bf16.mxu0 (!%p213_p2), %v825_v2 }
   0xd   : > { %s1025_s22 = smov (!%p240_p3, %s702_s22), 1 }
   0xe   : > { %s734_s29 = sshll.u32 %s1025_s22, 5  ;;  %s247_s15 = scalar_lea.vmem %s1023_s6, %s1025_s22 }
   0xf   : > { %s244_s8 = scalar_lea.vmem %s1017_s0, %s734_s29  ;;  %760 = vmatpush3.bf16.msra.mxu0 %v825_v2 }
  0x10   : > { %v249_v3 = vld [vmem:[%s244_s8] sm:$0xff]   ;;  %v251_v4 = vld [vmem:[%s244_s8 + $0x8] sm:$0xff]   ;;  %v253_v10 = vld [vmem:[%s244_s8 + $0x10] sm:$0xff]   ;;  %761 = vmatprep.subr.bf16.mxu0 %v826_v8 }
  0x11   : > { %v442_v5 = vunpack.c.l.bf16 %v249_v3  ;;  %v443_v6 = vunpack.c.h.bf16 %v249_v3  ;;  %v444_v7 = vunpack.c.l.bf16 %v251_v4  ;;  %v445_v9 = vunpack.c.h.bf16 %v251_v4  ;;  %763 = vmatprep.mubr.msk.bf16.mxu0 %vm316_vm0, %v249_v3  ;;  %v255_v19 = vld [vmem:[%s244_s8 + $0x18] sm:$0xff]  }
  0x12   : > { %v446_v14 = vunpack.c.l.bf16 %v253_v10  ;;  %v447_v17 = vunpack.c.h.bf16 %v253_v10  ;;  %v448_v21 = vunpack.c.l.bf16 %v255_v19  ;;  %v449_v24 = vunpack.c.h.bf16 %v255_v19 }
  0x13   : > { %v450_v11 = vsel %vm316_vm0, %v442_v5, 0.0  ;;  %v451_v12 = vsel %vm316_vm0, %v443_v6, 0.0  ;;  %v453_v13 = vsel %vm316_vm0, %v444_v7, 0.0  ;;  %v455_v16 = vsel %vm316_vm0, %v445_v9, 0.0  ;;  %762 = vmatpush3.bf16.msra.mxu0 %v826_v8 }
  0x14   : > { %v452_v15 = vadd.f32 %v451_v12, %v450_v11  ;;  %v457_v20 = vsel %vm316_vm0, %v446_v14, 0.0  ;;  %v459_v23 = vsel %vm316_vm0, %v447_v17, 0.0  ;;  %v461_v26 = vsel %vm316_vm0, %v448_v21, 0.0 }
  0x15   : > { %v463_v28 = vsel %vm316_vm0, %v449_v24, 0.0 }
  0x16   : > { %v454_v18 = vadd.f32 %v453_v13, %v452_v15  ;;  %764 = vmatmul.mubr.msk.bf16.vlgmr.msra.gmra.mrb[0].mxu0 %vm316_vm0, %v251_v4 }
  0x17   : > { %767 = vmatprep.mubr.msk.bf16.mxu0 %vm316_vm0, %v253_v10 }
  0x18   : > { %v456_v22 = vadd.f32 %v455_v16, %v454_v18 }
  0x1a   : > { %v458_v25 = vadd.f32 %v457_v20, %v456_v22 }
  0x1c   : > { %v460_v27 = vadd.f32 %v459_v23, %v458_v25 }
  0x1e   : > { %v462_v29 = vadd.f32 %v461_v26, %v460_v27  ;;  %768 = vmatmul.mubr.msk.bf16.gmra.mrb[4].mxu0 %vm316_vm0, %v255_v19 }
  0x20   : > { %v950_v30 = vadd.f32 %v463_v28, %v462_v29 }
  0xe9   : > { %v765_v37 = vpop.f32.mrb[0].mxu0 }
  0xea   : > { %v372_v38 = vadd.f32 %v765_v37, %v709_v36  ;;  %v363_v39 = vpop.f32.mrb[1].mxu0 }
  0xeb   : > { %v364_v40 = vadd.f32 %v709_v36, %v363_v39  ;;  %v766_v41 = vpop.f32.mrb[2].mxu0 }
  0xec   : > { %v724_v42 = vmul.f32 -1.442695, %v372_v38  ;;  %v375_v43 = vadd.f32 %v766_v41, %v709_v36  ;;  %v366_v44 = vpop.f32.mrb[3].mxu0 }
  0xed   : > { %v722_v45 = vmul.f32 -1.442695, %v364_v40  ;;  %v367_v46 = vadd.f32 %v709_v36, %v366_v44  ;;  %v465_v40 = vrot.slane %v950_v30, 4 }
  0xee   : > { %835 = vpow2.f32 %v724_v42  ;;  %v725_v47 = vmul.f32 -1.442695, %v375_v43 }
  0xef   : > { %837 = vpow2.f32 %v722_v45  ;;  %v723_v48 = vmul.f32 -1.442695, %v367_v46  ;;  %v466_v43 = vadd.f32 %v465_v40, %v950_v30  ;;  %v495_v46 = vld [vmem:[%s1020_s3] sm:$0xff]  ;;  %v498_v30 = vld [vmem:[%s1020_s3 + $0x18] sm:$0xff] }
  0xf0   : > { %839 = vpow2.f32 %v725_v47  ;;  %v496_v47 = vld [vmem:[%s1020_s3 + $0x8] sm:$0xff] }
  0xf1   : > { %841 = vpow2.f32 %v723_v48  ;;  %v769_v49 = vpop.f32.mrb[4].mxu0 }
  0xf2   : > { %v388_v50 = vadd.f32 %v769_v49, %v709_v36  ;;  %v379_v51 = vpop.f32.mrb[5].mxu0  ;;  %v467_v49 = vrot.slane %v466_v43, 2 }
  0xf3   : > { %v380_v52 = vadd.f32 %v709_v36, %v379_v51  ;;  %v770_v53 = vpop.f32.mrb[6].mxu0 }
  0xf4   : > { %v728_v54 = vmul.f32 -1.442695, %v388_v50  ;;  %v391_v55 = vadd.f32 %v770_v53, %v709_v36  ;;  %v382_v56 = vpop.f32.mrb[7].mxu0  ;;  %v801_v50 = vpack.c.bf16 %v496_v47, %v495_v46  ;;  %v468_v53 = vadd.f32 %v467_v49, %v466_v43 }
  0xf5   : > { %v726_v57 = vmul.f32 -1.442695, %v380_v52  ;;  %v383_v58 = vadd.f32 %v709_v36, %v382_v56  ;;  %v497_v52 = vld [vmem:[%s1020_s3 + $0x10] sm:$0xff]  ;;  %v500_v56 = vld [vmem:[%s1020_s3 + $0x28] sm:$0xff] }
  0xf6   : > { %843 = vpow2.f32 %v728_v54  ;;  %v729_v59 = vmul.f32 -1.442695, %v391_v55  ;;  %v804_v54 = vpack.c.bf16 %v498_v30, %v497_v52  ;;  %v499_v55 = vld [vmem:[%s1020_s3 + $0x20] sm:$0xff] }
  0xf7   : > { %845 = vpow2.f32 %v726_v57  ;;  %v727_v60 = vmul.f32 -1.442695, %v383_v58  ;;  %v469_v57 = vrot.slane %v468_v53, 1  ;;  %v807_v58 = vpack.c.bf16 %v500_v56, %v499_v55 }
  0xf8   : > { %v836_v61 = vpop.eup %835  ;;  %847 = vpow2.f32 %v729_v59  ;;  %v502_v59 = vld [vmem:[%s1020_s3 + $0x38] sm:$0xff] }
  0xf9   : > { %v838_v62 = vpop.eup %837  ;;  %v420_v63 = vadd.f32 1.0, %v836_v61  ;;  %849 = vpow2.f32 %v727_v60  ;;  %v470_v60 = vadd.f32 %v469_v57, %v468_v53 }
  0xfa   : > { %v840_v0 = vpop.eup %839  ;;  %v418_v1 = vadd.f32 1.0, %v838_v62 }
  0xfb   : > { %v842_v2 = vpop.eup %841  ;;  %v421_v3 = vadd.f32 1.0, %v840_v0  ;;  %v471_v62 = vmul.f32 0.015625, %v470_v60 }
  0xfc   : > { %851 = vrcp.f32 %v418_v1  ;;  %v419_v4 = vadd.f32 1.0, %v842_v2  ;;  %v651_v2 = vld [vmem:[%s1022_s5] sm:$0x1] }
  0xfd   : > { %853 = vrcp.f32 %v420_v63 }
  0xfe   : > { %855 = vrcp.f32 %v419_v4 }
  0xff   : > { %857 = vrcp.f32 %v421_v3 }
 0x100   : > { %v844_v5 = vpop.eup %843 }
 0x101   : > { %v846_v6 = vpop.eup %845  ;;  %v424_v7 = vadd.f32 1.0, %v844_v5 }
 0x102   : > { %v848_v8 = vpop.eup %847  ;;  %v422_v9 = vadd.f32 1.0, %v846_v6 }
 0x103   : > { %v850_v10 = vpop.eup %849  ;;  %v425_v11 = vadd.f32 1.0, %v848_v8 }
 0x104   : > { %859 = vrcp.f32 %v422_v9  ;;  %v423_v12 = vadd.f32 1.0, %v850_v10 }
 0x105   : > { %861 = vrcp.f32 %v424_v7 }
 0x106   : > { %v852_v13 = vpop.eup %851  ;;  %863 = vrcp.f32 %v423_v12 }
 0x107   : > { %v854_v14 = vpop.eup %853  ;;  %865 = vrcp.f32 %v425_v11  ;;  %v473_v16 = vsel %vm472_vm2, %v852_v13, 0.0 }
 0x108   : > { %v856_v15 = vpop.eup %855  ;;  %v476_v20 = vsel %vm472_vm2, %v854_v14, 0.0 }
 0x109   : > { %v474_v17 = vsel %vm472_vm2, %v856_v15, 0.0  ;;  %v858_v18 = vpop.eup %857 }
 0x10a   : > { %v475_v19 = vadd.f32 %v474_v17, %v473_v16  ;;  %v478_v22 = vsel %vm472_vm2, %v858_v18, 0.0 }
 0x10c   : > { %v477_v21 = vadd.f32 %v476_v20, %v475_v19 }
 0x10e   : > { %v860_v23 = vpop.eup %859  ;;  %v479_v24 = vadd.f32 %v478_v22, %v477_v21 }
 0x10f   : > { %v862_v25 = vpop.eup %861  ;;  %v480_v26 = vsel %vm472_vm2, %v860_v23, 0.0 }
 0x110   : > { %v864_v27 = vpop.eup %863  ;;  %v481_v28 = vadd.f32 %v480_v26, %v479_v24  ;;  %v484_v34 = vsel %vm472_vm2, %v862_v25, 0.0 }
 0x111   : > { %v482_v29 = vsel %vm472_vm2, %v864_v27, 0.0  ;;  %v866_v31 = vpop.eup %865 }
 0x112   : > { %v483_v32 = vadd.f32 %v482_v29, %v481_v28  ;;  %v486_v37 = vsel %vm472_vm2, %v866_v31, 0.0 }
 0x114   : > { %v485_v36 = vadd.f32 %v484_v34, %v483_v32 }
 0x116   : > { %v487_v38 = vadd.f32 %v486_v37, %v485_v36 }
 0x118   : > { %v488_v39 = vrot.slane %v487_v38, 4 }
 0x11a   : > { %v489_v41 = vadd.f32 %v488_v39, %v487_v38 }
 0x11c   : > { %v490_v42 = vrot.slane %v489_v41, 2 }
 0x11e   : > { %v491_v44 = vadd.f32 %v490_v42, %v489_v41 }
 0x120   : > { %v492_v45 = vrot.slane %v491_v44, 1 }
 0x122   : > { %v493_v48 = vadd.f32 %v492_v45, %v491_v44 }
 0x124   : > { %v494_v51 = vmul.f32 0.015625, %v493_v48 }
 0x126   : > { %776 = vmatmul.mubr.msk.f32.vlgmr.msra.gmra.mrb[0].mxu1 %vm472_vm2, %v494_v51 }
 0x127   : > { %802 = vmatpush3.bf16.msra.mxu1 %v801_v50  ;;  %794 = vmatprep.mubr.msk.f32.mxu1 %vm876_vm1, %v877_v35  ;;  %v501_v35 = vld [vmem:[%s1020_s3 + $0x30] sm:$0xff] }
 0x128   : > { %803 = vmatprep.subr.bf16.mxu1 %v875_v33  ;;  %v810_v61 = vpack.c.bf16 %v502_v59, %v501_v35 }
 0x12b   : > { %805 = vmatpush3.bf16.msra.mxu1 %v804_v54 }
 0x12c   : > { %806 = vmatprep.subr.bf16.mxu1 %v875_v33 }
 0x12f   : > { %808 = vmatpush3.bf16.msra.mxu1 %v807_v58 }
 0x130   : > { %809 = vmatprep.subr.bf16.mxu1 %v875_v33 }
 0x133   : > { %811 = vmatpush3.bf16.msra.mxu1 %v810_v61 }
 0x136   : > { %795 = vmatmul.mubr.msk.f32.vlgmr.msra.gmra.mrb[2].mxu1 %vm316_vm0, %v471_v62 }
 0x1f9   : > { %v574_v63 = vpop.f32.mrb[0].mxu1 }
 0x1fa   : > { %v777_v0 = vpop.f32.mrb[1].mxu1 }
 0x209   : > { %v647_v1 = vpop.f32.mrb[2].mxu1 }
 0x20a   : > { %v648_v3 = vadd.f32 %v647_v1, %v574_v63  ;;  %v796_v4 = vpop.f32.mrb[3].mxu1 }
 0x20c   : > { %v652_v5 = vadd.f32 %v651_v2, %v648_v3 }
 0x20e   : > { %654 = vst.msk [vmem:[%s247_s15] sm:$0x1] %vm653_vm3, %v652_v5 }
 0x20f PF: > { %s16_s21 = sadd.s32 1, %s873_s21  }
 0x210   : > { %p13_p4 = scmp.ge.s32.totalorder %s16_s21, 4  }
 0x212   :  { %15 = sbr.rel (!%p13_p4) target bundleno = 1 (0x1), region = 74 }

// kernel: _lambda_.3
= control target key start
LH: loop header
LB: loop body
LE: loop exit
PB: predicated region body
PF: predicated region fallthrough
CT: control target
= control target key end

     0   :  { %s3762_s18 = smov 0   ;;  %s4420_s0 = inlined_call_operand.vmem [shape: bf16[2,64,64], index: 0, kind: input, shape index: {}]   ;;  %s4421_s1 = inlined_call_operand.vmem [shape: bf16[9,64,64], index: 1, kind: input, shape index: {}]   ;;  %s4422_s2 = inlined_call_operand.vmem [shape: f32[1,64], index: 2, kind: input, shape index: {}]   ;;  %s4423_s3 = inlined_call_operand.vmem [shape: bf16[9,64,64], index: 3, kind: input, shape index: {}]   ;;  %s4424_s4 = inlined_call_operand.vmem [shape: f32[1,64], index: 4, kind: input, shape index: {}]   ;;  %s4425_s5 = inlined_call_operand.vmem [shape: bf16[2,64,64], index: 5, kind: output, shape index: {}]  }
   0x1 LB: > { %s2760_s19 = sadd.s32 4294967295, %s3729_s18   ;;  %p2764_p0 = scmp.ge.s32.totalorder %s3729_s18, 1  ;;  %s3729_s18 = sphi %s3762_s18, %s15_s18  }
   0x2   : > { %p187_p1 = scmp.lt.s32.totalorder %s3729_s18, 3 }
   0x4   : > { %p188_p2 = pnand %p2764_p0, %p187_p1 }
   0x5   : > { %v3651_v0 = vld [vmem:[%s4421_s1 + $0x20] sm:$0xff] (!%p188_p2)   ;;  %p215_p3 = scmp.lt.s32.totalorder (!%p188_p2), %s2760_s19, 1  ;;  %v3652_v1 = vld [vmem:[%s4421_s1 + $0x28] sm:$0xff] (!%p188_p2)   ;;  %vm234_vm0 = vcmask (!%p188_p2), 523264   ;;  %v3781_v2 = vld [vmem:[%s4421_s1 + $0x30] sm:$0xff] (!%p188_p2)   ;;  %v3731_v3 = vmov (!%p188_p2), 0.0  }
   0x6   : > { %191 = sbr.rel (%p188_p2) target bundleno = 754 (0x2f2), region = 40  ;;  %3226 = vmatprep.subr.bf16.mxu0 (!%p188_p2), %v3651_v0  ;;  %235 = vst.msk [vmem:[#allocation2] sm:$0xff] (!%p188_p2), %vm234_vm0, %v3731_v3  ;;  %vm236_vm1 = vcmask (!%p188_p2), 517120   ;;  %238 = vst.msk [vmem:[#allocation2 + $0x10] sm:$0xff] (!%p188_p2), %vm234_vm0, %v3731_v3  ;;  %v3654_v11 = vld [vmem:[%s4421_s1 + $0x38] sm:$0xff] (!%p188_p2)   ;;  %v3655_v17 = vld [vmem:[%s4421_s1] sm:$0xff] (!%p188_p2)  }
   0x7   : > { %3227 = vmatpush3.bf16.msra.mxu0 (!%p188_p2), %v3651_v0  ;;  %240 = vst.msk [vmem:[#allocation2 + $0x20] sm:$0xff] (!%p188_p2), %vm234_vm0, %v3731_v3  ;;  %242 = vst.msk [vmem:[#allocation2 + $0x30] sm:$0xff] (!%p188_p2), %vm234_vm0, %v3731_v3  ;;  %v3656_v26 = vld [vmem:[%s4421_s1 + $0x8] sm:$0xff] (!%p188_p2)   ;;  %v3657_v30 = vld [vmem:[%s4421_s1 + $0x10] sm:$0xff] (!%p188_p2)   ;;  %vm2696_vm2 = vcmask (!%p188_p2), 519168  }
   0x8   : > { %3228 = vmatprep.subr.bf16.mxu0 (!%p188_p2), %v3652_v1  ;;  %244 = vst.msk [vmem:[#allocation2 + $0x40] sm:$0xff] (!%p188_p2), %vm234_vm0, %v3731_v3  ;;  %246 = vst.msk [vmem:[#allocation2 + $0x50] sm:$0xff] (!%p188_p2), %vm234_vm0, %v3731_v3  ;;  %v3658_v35 = vld [vmem:[%s4421_s1 + $0x18] sm:$0xff] (!%p188_p2)   ;;  %v3659_v36 = vld [vmem:[%s4421_s1 + $0x40] sm:$0xff] (!%p188_p2)  }
   0x9   : > { %248 = vst.msk [vmem:[#allocation2 + $0x60] sm:$0xff] (!%p188_p2), %vm234_vm0, %v3731_v3  ;;  %250 = vst.msk [vmem:[#allocation2 + $0x70] sm:$0xff] (!%p188_p2), %vm234_vm0, %v3731_v3  ;;  %v3660_v43 = vld [vmem:[%s4421_s1 + $0x48] sm:$0xff] (!%p188_p2)   ;;  %v3661_v44 = vld [vmem:[%s4421_s1 + $0x50] sm:$0xff] (!%p188_p2)  }
   0xa   : > { %252 = vst.msk [vmem:[#allocation2 + $0x80] sm:$0xff] (!%p188_p2), %vm234_vm0, %v3731_v3  ;;  %254 = vst.msk [vmem:[#allocation2 + $0x90] sm:$0xff] (!%p188_p2), %vm234_vm0, %v3731_v3  ;;  %v3662_v51 = vld [vmem:[%s4421_s1 + $0x58] sm:$0xff] (!%p188_p2)   ;;  %v3663_v53 = vld [vmem:[%s4421_s1 + $0x60] sm:$0xff] (!%p188_p2)  }
   0xb   : > { %1450 = vst.msk [vmem:[#allocation3] sm:$0xff] (!%p188_p2), %vm234_vm0, %v3731_v3  ;;  %1452 = vst.msk [vmem:[#allocation3 + $0x10] sm:$0xff] (!%p188_p2), %vm234_vm0, %v3731_v3  ;;  %3229 = vmatpush3.bf16.msra.mxu0 (!%p188_p2), %v3652_v1  ;;  %v3664_v58 = vld [vmem:[%s4421_s1 + $0x68] sm:$0xff] (!%p188_p2)   ;;  %v3665_v62 = vld [vmem:[%s4421_s1 + $0x70] sm:$0xff] (!%p188_p2)  }
   0xc   : > { %1454 = vst.msk [vmem:[#allocation3 + $0x20] sm:$0xff] (!%p188_p2), %vm234_vm0, %v3731_v3  ;;  %1456 = vst.msk [vmem:[#allocation3 + $0x30] sm:$0xff] (!%p188_p2), %vm234_vm0, %v3731_v3  ;;  %3230 = vmatprep.subr.bf16.mxu0 (!%p188_p2), %v3781_v2  ;;  %v3666_v0 = vld [vmem:[%s4421_s1 + $0x78] sm:$0xff] (!%p188_p2)  }
   0xd   : > { %s4427_s19 = smov (!%p215_p3, %s2760_s19), 1  ;;  %1458 = vst.msk [vmem:[#allocation3 + $0x40] sm:$0xff] %vm234_vm0, %v3731_v3  ;;  %1460 = vst.msk [vmem:[#allocation3 + $0x50] sm:$0xff] %vm234_vm0, %v3731_v3  ;;  %v273_v31 = vld [vmem:[#allocation2] sm:$0xff] }
   0xe   : > { %s3053_s26 = sshll.u32 %s4427_s19, 5  ;;  %1462 = vst.msk [vmem:[#allocation3 + $0x60] sm:$0xff] %vm234_vm0, %v3731_v3  ;;  %1464 = vst.msk [vmem:[#allocation3 + $0x70] sm:$0xff] %vm234_vm0, %v3731_v3 }
   0xf   : > { %1466 = vst.msk [vmem:[#allocation3 + $0x80] sm:$0xff] %vm234_vm0, %v3731_v3  ;;  %1468 = vst.msk [vmem:[#allocation3 + $0x90] sm:$0xff] %vm234_vm0, %v3731_v3  ;;  %s3809_s29 = scalar_lea.vmem %s4420_s0, %s3053_s26  ;;  %3231 = vmatpush3.bf16.msra.mxu0 %v3781_v2  ;;  %v3667_v2 = vld [vmem:[%s4421_s1 + $0x80] sm:$0xff]   ;;  %s4389_s17 = scalar_lea.vmem %s4425_s5, %s3053_s26 }
  0x10   : > { %237 = vst.msk [vmem:[#allocation2 + $0x8] sm:$0x3] %vm236_vm1, %v3731_v3  ;;  %239 = vst.msk [vmem:[#allocation2 + $0x18] sm:$0x3] %vm236_vm1, %v3731_v3  ;;  %v3832_v4 = vld [vmem:[%s3809_s29] sm:$0xff]   ;;  %v3835_v5 = vld [vmem:[%s3809_s29 + $0x8] sm:$0xff]   ;;  %3232 = vmatprep.subr.bf16.mxu0 %v3654_v11 }
  0x11   : > { %241 = vst.msk [vmem:[#allocation2 + $0x28] sm:$0x3] %vm236_vm1, %v3731_v3  ;;  %243 = vst.msk [vmem:[#allocation2 + $0x38] sm:$0x3] %vm236_vm1, %v3731_v3  ;;  %v3065_v6 = vunpack.c.l.bf16 %v3832_v4  ;;  %v3066_v7 = vunpack.c.h.bf16 %v3832_v4  ;;  %v3069_v8 = vunpack.c.l.bf16 %v3835_v5  ;;  %v3070_v9 = vunpack.c.h.bf16 %v3835_v5  ;;  %v3842_v10 = vld [vmem:[%s3809_s29 + $0x10] sm:$0xff]   ;;  %v3851_v14 = vld [vmem:[%s3809_s29 + $0x18] sm:$0xff]  }
  0x12   : > { %245 = vst.msk [vmem:[#allocation2 + $0x48] sm:$0x3] %vm236_vm1, %v3731_v3  ;;  %247 = vst.msk [vmem:[#allocation2 + $0x58] sm:$0x3] %vm236_vm1, %v3731_v3  ;;  %v3073_v12 = vunpack.c.l.bf16 %v3842_v10  ;;  %v3074_v13 = vunpack.c.h.bf16 %v3842_v10  ;;  %v3077_v15 = vunpack.c.l.bf16 %v3851_v14  ;;  %v3078_v16 = vunpack.c.h.bf16 %v3851_v14 }
  0x13   : > { %249 = vst.msk [vmem:[#allocation2 + $0x68] sm:$0x3] %vm236_vm1, %v3731_v3  ;;  %251 = vst.msk [vmem:[#allocation2 + $0x78] sm:$0x3] %vm236_vm1, %v3731_v3  ;;  %3233 = vmatpush3.bf16.msra.mxu0 %v3654_v11  ;;  %v3668_v11 = vld [vmem:[%s4421_s1 + $0x88] sm:$0xff]  }
  0x14   : > { %253 = vst.msk [vmem:[#allocation2 + $0x88] sm:$0x3] %vm236_vm1, %v3731_v3  ;;  %255 = vst.msk [vmem:[#allocation2 + $0x98] sm:$0x3] %vm236_vm1, %v3731_v3  ;;  %3242 = vmatprep.subr.bf16.mxu0 %v3655_v17 }
  0x15   : > { %1451 = vst.msk [vmem:[#allocation3 + $0x8] sm:$0x3] %vm236_vm1, %v3731_v3  ;;  %1453 = vst.msk [vmem:[#allocation3 + $0x18] sm:$0x3] %vm236_vm1, %v3731_v3 }
  0x16   : > { %1455 = vst.msk [vmem:[#allocation3 + $0x28] sm:$0x3] %vm236_vm1, %v3731_v3  ;;  %1457 = vst.msk [vmem:[#allocation3 + $0x38] sm:$0x3] %vm236_vm1, %v3731_v3 }
  0x17   : > { %1459 = vst.msk [vmem:[#allocation3 + $0x48] sm:$0x3] %vm236_vm1, %v3731_v3  ;;  %1461 = vst.msk [vmem:[#allocation3 + $0x58] sm:$0x3] %vm236_vm1, %v3731_v3  ;;  %v293_v18 = vld [vmem:[#allocation2 + $0x1] sm:$0xff] }
  0x18   : > { %1463 = vst.msk [vmem:[#allocation3 + $0x68] sm:$0x3] %vm236_vm1, %v3731_v3  ;;  %1465 = vst.msk [vmem:[#allocation3 + $0x78] sm:$0x3] %vm236_vm1, %v3731_v3  ;;  %v516_v45 = vld [vmem:[#allocation2 + $0x2] sm:$0xff] }
  0x19   : > { %1467 = vst.msk [vmem:[#allocation3 + $0x88] sm:$0x3] %vm236_vm1, %v3731_v3  ;;  %1469 = vst.msk [vmem:[#allocation3 + $0x98] sm:$0x3] %vm236_vm1, %v3731_v3 }
  0x1a   : > { %265 = vst.msk [vmem:[#allocation2 + $0x11] sm:$0xff] %vm234_vm0, %v3065_v6  ;;  %266 = vst.msk [vmem:[#allocation2 + $0x21] sm:$0xff] %vm234_vm0, %v3066_v7 }
  0x1b   : > { %267 = vst.msk [vmem:[#allocation2 + $0x31] sm:$0xff] %vm234_vm0, %v3069_v8  ;;  %268 = vst.msk [vmem:[#allocation2 + $0x41] sm:$0xff] %vm234_vm0, %v3070_v9 }
  0x1c   : > { %269 = vst.msk [vmem:[#allocation2 + $0x51] sm:$0xff] %vm234_vm0, %v3073_v12  ;;  %270 = vst.msk [vmem:[#allocation2 + $0x61] sm:$0xff] %vm234_vm0, %v3074_v13 }
  0x1d   : > { %271 = vst.msk [vmem:[#allocation2 + $0x71] sm:$0xff] %vm234_vm0, %v3077_v15  ;;  %272 = vst.msk [vmem:[#allocation2 + $0x81] sm:$0xff] %vm234_vm0, %v3078_v16 }
  0x21   : > { %v3883_v19 = vld [vmem:[#allocation2 + $0x11] sm:$0xff]  ;;  %v3885_v20 = vld [vmem:[#allocation2 + $0x21] sm:$0xff] }
  0x22   : > { %v3887_v21 = vld [vmem:[#allocation2 + $0x31] sm:$0xff]  ;;  %v301_v22 = vpack.c.bf16 %v3883_v19, %v293_v18  ;;  %v3894_v24 = vld [vmem:[#allocation2 + $0x41] sm:$0xff] }
  0x23   : > { %v3892_v23 = vpack.c.bf16 %v3887_v21, %v3885_v20  ;;  %v3896_v25 = vld [vmem:[#allocation2 + $0x51] sm:$0xff]  ;;  %v3910_v28 = vld [vmem:[#allocation2 + $0x61] sm:$0xff] }
  0x24   : > { %v3903_v27 = vpack.c.bf16 %v3896_v25, %v3894_v24  ;;  %3234 = vmatprep.mubr.msk.bf16.mxu0 %vm234_vm0, %v301_v22  ;;  %v3912_v29 = vld [vmem:[#allocation2 + $0x71] sm:$0xff]  ;;  %v275_v37 = vld [vmem:[#allocation2 + $0x20] sm:$0xff] }
  0x25   : > { %3235 = vmatmul.mubr.msk.bf16.vlgmr.msra.gmra.mrb[0].mxu0 %vm234_vm0, %v3892_v23  ;;  %v3917_v32 = vld [vmem:[#allocation2 + $0x10] sm:$0xff]  ;;  %v3921_v33 = vpack.c.bf16 %v3912_v29, %v3910_v28  ;;  %v277_v39 = vld [vmem:[#allocation2 + $0x40] sm:$0xff] }
  0x26   : > { %3243 = vmatpush3.bf16.msra.mxu0 %v3655_v17  ;;  %3238 = vmatprep.mubr.msk.bf16.mxu0 %vm234_vm0, %v3903_v27  ;;  %v281_v34 = vpack.c.bf16 %v3917_v32, %v273_v31  ;;  %v3932_v38 = vld [vmem:[#allocation2 + $0x30] sm:$0xff]  ;;  %v279_v46 = vld [vmem:[#allocation2 + $0x60] sm:$0xff]  ;;  %v654_v1 = vpack.c.bf16 %v275_v37, %v3917_v32  ;;  %v3670_v31 = vld [vmem:[%s4421_s1 + $0x98] sm:$0xff]  }
  0x27   : > { %3244 = vmatprep.subr.bf16.mxu0 %v3656_v26  ;;  %v278_v40 = vld [vmem:[#allocation2 + $0x50] sm:$0xff]  ;;  %v3936_v41 = vpack.c.bf16 %v3932_v38, %v275_v37  ;;  %v3958_v52 = vld [vmem:[#allocation2 + $0x22] sm:$0xff]  ;;  %v655_v3 = vpack.c.bf16 %v277_v39, %v3932_v38 }
  0x28   : > { %v3938_v42 = vpack.c.bf16 %v278_v40, %v277_v39  ;;  %v280_v47 = vld [vmem:[#allocation2 + $0x70] sm:$0xff]  ;;  %v3968_v55 = vld [vmem:[#allocation2 + $0x42] sm:$0xff]  ;;  %v656_v17 = vpack.c.bf16 %v279_v46, %v278_v40 }
  0x29   : > { %v3950_v48 = vld [vmem:[#allocation2 + $0x12] sm:$0xff]  ;;  %v3952_v49 = vpack.c.bf16 %v280_v47, %v279_v46  ;;  %v3983_v60 = vld [vmem:[#allocation2 + $0x62] sm:$0xff] }
  0x2a   : > { %3245 = vmatpush3.bf16.msra.mxu0 %v3656_v26  ;;  %v524_v50 = vpack.c.bf16 %v3950_v48, %v516_v45  ;;  %v3965_v54 = vld [vmem:[#allocation2 + $0x32] sm:$0xff]  ;;  %v4012_v18 = vld [vmem:[#allocation2 + $0x80] sm:$0xff]  ;;  %v3676_v38 = vld [vmem:[%s4421_s1 + $0xc8] sm:$0xff]  }
  0x2b   : > { %3246 = vmatprep.subr.bf16.mxu0 %v3657_v30  ;;  %v3970_v56 = vld [vmem:[#allocation2 + $0x52] sm:$0xff]  ;;  %v3974_v57 = vpack.c.bf16 %v3965_v54, %v3958_v52  ;;  %v657_v26 = vpack.c.bf16 %v4012_v18, %v280_v47  ;;  %v3671_v32 = vld [vmem:[%s4421_s1 + $0xa0] sm:$0xff]   ;;  %v3680_v46 = vld [vmem:[%s4421_s1 + $0xe8] sm:$0xff]  }
  0x2c   : > { %v3981_v59 = vpack.c.bf16 %v3970_v56, %v3968_v55  ;;  %v3985_v61 = vld [vmem:[#allocation2 + $0x72] sm:$0xff]  ;;  %v916_v37 = vpack.c.bf16 %v3983_v60, %v3970_v56  ;;  %v913_v39 = vld [vmem:[#allocation2 + $0x82] sm:$0xff] }
  0x2d   : > { %3239 = vmatmul.mubr.msk.bf16.gmra.mrb[4].mxu0 %vm234_vm0, %v3921_v33  ;;  %v3996_v63 = vpack.c.bf16 %v3985_v61, %v3983_v60  ;;  %v3669_v22 = vld [vmem:[%s4421_s1 + $0x90] sm:$0xff]   ;;  %v3679_v45 = vld [vmem:[%s4421_s1 + $0xe0] sm:$0xff]  }
  0x2e   : > { %3247 = vmatpush3.bf16.msra.mxu0 %v3657_v30  ;;  %3250 = vmatprep.mubr.msk.bf16.mxu0 %vm234_vm0, %v281_v34  ;;  %v784_v30 = vpack.c.bf16 %v3885_v20, %v3883_v19  ;;  %v785_v34 = vpack.c.bf16 %v3894_v24, %v3887_v21  ;;  %v786_v19 = vpack.c.bf16 %v3910_v28, %v3896_v25  ;;  %v3672_v20 = vld [vmem:[%s4421_s1 + $0xa8] sm:$0xff]   ;;  %v3673_v21 = vld [vmem:[%s4421_s1 + $0xb0] sm:$0xff]   ;;  %v3674_v28 = vld [vmem:[%s4421_s1 + $0xb8] sm:$0xff]  }
  0x2f   : > { %3248 = vmatprep.subr.bf16.mxu0 %v3658_v35  ;;  %v914_v25 = vpack.c.bf16 %v3958_v52, %v3950_v48  ;;  %v3677_v40 = vld [vmem:[%s4421_s1 + $0xd0] sm:$0xff]  }
  0x30   : > { %v1044_v47 = vld [vmem:[#allocation2 + $0x90] sm:$0xff] }
  0x31   : > { %v1048_v48 = vpack.c.bf16 %v1044_v47, %v4012_v18  ;;  %v3689_v56 = vld [vmem:[%s4423_s3 + $0x30] sm:$0xff]  }
  0x32   : > { %3249 = vmatpush3.bf16.msra.mxu0 %v3658_v35  ;;  %v4039_v35 = vld [vmem:[#allocation2 + $0x81] sm:$0xff] }
  0x33   : > { %3258 = vmatprep.subr.bf16.mxu0 %v3659_v36  ;;  %v787_v24 = vpack.c.bf16 %v4039_v35, %v3912_v29  ;;  %v915_v29 = vpack.c.bf16 %v3968_v55, %v3965_v54  ;;  %v3687_v54 = vld [vmem:[%s4423_s3 + $0x20] sm:$0xff]   ;;  %v3688_v55 = vld [vmem:[%s4423_s3 + $0x28] sm:$0xff]  }
  0x34   : > { %3370 = vmatprep.subr.bf16.mxu1 %v3687_v54 }
  0x35   : > { %3251 = vmatmul.mubr.msk.bf16.vlgmr.msra.gmra.mrb[0].mxu0 %vm234_vm0, %v3936_v41  ;;  %3371 = vmatpush3.bf16.msra.mxu1 %v3687_v54 }
  0x36   : > { %3259 = vmatpush3.bf16.msra.mxu0 %v3659_v36  ;;  %3254 = vmatprep.mubr.msk.bf16.mxu0 %vm234_vm0, %v3938_v42  ;;  %v3675_v36 = vld [vmem:[%s4421_s1 + $0xc0] sm:$0xff]  }
  0x37   : > { %3260 = vmatprep.subr.bf16.mxu0 %v3660_v43  ;;  %3372 = vmatprep.subr.bf16.mxu1 %v3688_v55 }
  0x39   : > { %3373 = vmatpush3.bf16.msra.mxu1 %v3688_v55 }
  0x3a   : > { %3261 = vmatpush3.bf16.msra.mxu0 %v3660_v43  ;;  %v917_v43 = vpack.c.bf16 %v913_v39, %v3985_v61  ;;  %3374 = vmatprep.subr.bf16.mxu1 %v3689_v56 }
  0x3b   : > { %3262 = vmatprep.subr.bf16.mxu0 %v3661_v44 }
  0x3d   : > { %3255 = vmatmul.mubr.msk.bf16.gmra.mrb[4].mxu0 %vm234_vm0, %v3952_v49  ;;  %3375 = vmatpush3.bf16.msra.mxu1 %v3689_v56  ;;  %v3696_v56 = vld [vmem:[%s4423_s3 + $0x48] sm:$0xff]  }
  0x3e   : > { %3263 = vmatpush3.bf16.msra.mxu0 %v3661_v44  ;;  %3266 = vmatprep.mubr.msk.bf16.mxu0 %vm234_vm0, %v524_v50  ;;  %v3678_v44 = vld [vmem:[%s4421_s1 + $0xd8] sm:$0xff]  }
  0x3f   : > { %3264 = vmatprep.subr.bf16.mxu0 %v3662_v51  ;;  %v3682_v50 = vld [vmem:[%s4421_s1 + $0xf8] sm:$0xff]  }
  0x42   : > { %3265 = vmatpush3.bf16.msra.mxu0 %v3662_v51  ;;  %v1174_v51 = vld [vmem:[#allocation2 + $0x91] sm:$0xff] }
  0x43   : > { %3274 = vmatprep.subr.bf16.mxu0 %v3663_v53  ;;  %v1178_v52 = vpack.c.bf16 %v1174_v51, %v4039_v35  ;;  %v3694_v51 = vld [vmem:[%s4423_s3 + $0x18] sm:$0xff]  }
  0x45   : > { %3267 = vmatmul.mubr.msk.bf16.vlgmr.msra.gmra.mrb[0].mxu0 %vm234_vm0, %v3974_v57 }
  0x46   : > { %3275 = vmatpush3.bf16.msra.mxu0 %v3663_v53  ;;  %3270 = vmatprep.mubr.msk.bf16.mxu0 %vm234_vm0, %v3981_v59  ;;  %v3686_v53 = vld [vmem:[%s4421_s1 + $0x118] sm:$0xff]  }
  0x47   : > { %3276 = vmatprep.subr.bf16.mxu0 %v3664_v58 }
  0x4a   : > { %3277 = vmatpush3.bf16.msra.mxu0 %v3664_v58  ;;  %v3691_v58 = vld [vmem:[%s4423_s3] sm:$0xff]  }
  0x4b   : > { %3278 = vmatprep.subr.bf16.mxu0 %v3665_v62 }
  0x4d   : > { %3271 = vmatmul.mubr.msk.bf16.gmra.mrb[4].mxu0 %vm234_vm0, %v3996_v63 }
  0x4e   : > { %3279 = vmatpush3.bf16.msra.mxu0 %v3665_v62  ;;  %3282 = vmatprep.mubr.msk.bf16.mxu0 %vm234_vm0, %v654_v1 }
  0x4f   : > { %3280 = vmatprep.subr.bf16.mxu0 %v3666_v0 }
  0x52   : > { %3281 = vmatpush3.bf16.msra.mxu0 %v3666_v0 }
  0x53   : > { %3290 = vmatprep.subr.bf16.mxu0 %v3667_v2 }
  0x55   : > { %3283 = vmatmul.mubr.msk.bf16.vlgmr.msra.gmra.mrb[0].mxu0 %vm234_vm0, %v655_v3 }
  0x56   : > { %3291 = vmatpush3.bf16.msra.mxu0 %v3667_v2  ;;  %3286 = vmatprep.mubr.msk.bf16.mxu0 %vm234_vm0, %v656_v17 }
  0x57   : > { %3292 = vmatprep.subr.bf16.mxu0 %v3668_v11 }
  0x5a   : > { %3293 = vmatpush3.bf16.msra.mxu0 %v3668_v11 }
  0x5b   : > { %3294 = vmatprep.subr.bf16.mxu0 %v3669_v22 }
  0x5d   : > { %3287 = vmatmul.mubr.msk.bf16.gmra.mrb[4].mxu0 %vm234_vm0, %v657_v26 }
  0x5e   : > { %3295 = vmatpush3.bf16.msra.mxu0 %v3669_v22  ;;  %3298 = vmatprep.mubr.msk.bf16.mxu0 %vm234_vm0, %v784_v30 }
  0x5f   : > { %3296 = vmatprep.subr.bf16.mxu0 %v3670_v31 }
  0x62   : > { %3297 = vmatpush3.bf16.msra.mxu0 %v3670_v31 }
  0x63   : > { %3306 = vmatprep.subr.bf16.mxu0 %v3671_v32 }
  0x65   : > { %3299 = vmatmul.mubr.msk.bf16.vlgmr.msra.gmra.mrb[0].mxu0 %vm234_vm0, %v785_v34 }
  0x66   : > { %3307 = vmatpush3.bf16.msra.mxu0 %v3671_v32  ;;  %3302 = vmatprep.mubr.msk.bf16.mxu0 %vm234_vm0, %v786_v19 }
  0x67   : > { %3308 = vmatprep.subr.bf16.mxu0 %v3672_v20 }
  0x6a   : > { %3309 = vmatpush3.bf16.msra.mxu0 %v3672_v20 }
  0x6b   : > { %3310 = vmatprep.subr.bf16.mxu0 %v3673_v21 }
  0x6d   : > { %3303 = vmatmul.mubr.msk.bf16.gmra.mrb[4].mxu0 %vm234_vm0, %v787_v24 }
  0x6e   : > { %3311 = vmatpush3.bf16.msra.mxu0 %v3673_v21  ;;  %3314 = vmatprep.mubr.msk.bf16.mxu0 %vm234_vm0, %v914_v25  ;;  %v1499_v21 = vld [vmem:[#allocation3 + $0x1] sm:$0xff] }
  0x6f   : > { %3312 = vmatprep.subr.bf16.mxu0 %v3674_v28 }
  0x72   : > { %3313 = vmatpush3.bf16.msra.mxu0 %v3674_v28 }
  0x73   : > { %3322 = vmatprep.subr.bf16.mxu0 %v3675_v36 }
  0x75   : > { %3315 = vmatmul.mubr.msk.bf16.vlgmr.msra.gmra.mrb[0].mxu0 %vm234_vm0, %v915_v29 }
  0x76   : > { %3323 = vmatpush3.bf16.msra.mxu0 %v3675_v36  ;;  %3318 = vmatprep.mubr.msk.bf16.mxu0 %vm234_vm0, %v916_v37 }
  0x77   : > { %3324 = vmatprep.subr.bf16.mxu0 %v3676_v38 }
  0x7a   : > { %3325 = vmatpush3.bf16.msra.mxu0 %v3676_v38 }
  0x7b   : > { %3326 = vmatprep.subr.bf16.mxu0 %v3677_v40 }
  0x7d   : > { %3319 = vmatmul.mubr.msk.bf16.gmra.mrb[4].mxu0 %vm234_vm0, %v917_v43  ;;  %v3692_v43 = vld [vmem:[%s4423_s3 + $0x8] sm:$0xff]  }
  0x7e   : > { %3327 = vmatpush3.bf16.msra.mxu0 %v3677_v40  ;;  %3330 = vmatprep.mubr.msk.bf16.mxu0 %vm234_vm0, %v3936_v41  ;;  %v3681_v41 = vld [vmem:[%s4421_s1 + $0xf0] sm:$0xff]  }
  0x7f   : > { %3328 = vmatprep.subr.bf16.mxu0 %v3678_v44 }
  0x82   : > { %3329 = vmatpush3.bf16.msra.mxu0 %v3678_v44  ;;  %v3693_v44 = vld [vmem:[%s4423_s3 + $0x10] sm:$0xff]  }
  0x83   : > { %3338 = vmatprep.subr.bf16.mxu0 %v3679_v45 }
  0x85   : > { %3331 = vmatmul.mubr.msk.bf16.vlgmr.msra.gmra.mrb[0].mxu0 %vm234_vm0, %v3938_v42  ;;  %v3683_v42 = vld [vmem:[%s4421_s1 + $0x100] sm:$0xff]  }
  0x86   : > { %3339 = vmatpush3.bf16.msra.mxu0 %v3679_v45  ;;  %3334 = vmatprep.mubr.msk.bf16.mxu0 %vm234_vm0, %v3952_v49  ;;  %v3684_v49 = vld [vmem:[%s4421_s1 + $0x108] sm:$0xff]  }
  0x87   : > { %3340 = vmatprep.subr.bf16.mxu0 %v3680_v46 }
  0x8a   : > { %3341 = vmatpush3.bf16.msra.mxu0 %v3680_v46 }
  0x8b   : > { %3342 = vmatprep.subr.bf16.mxu0 %v3681_v41 }
  0x8d   : > { %3335 = vmatmul.mubr.msk.bf16.gmra.mrb[4].mxu0 %vm234_vm0, %v1048_v48 }
  0x8e   : > { %3343 = vmatpush3.bf16.msra.mxu0 %v3681_v41  ;;  %3346 = vmatprep.mubr.msk.bf16.mxu0 %vm234_vm0, %v3892_v23  ;;  %v3685_v23 = vld [vmem:[%s4421_s1 + $0x110] sm:$0xff]   ;;  %v1479_v41 = vld [vmem:[#allocation3] sm:$0xff] }
  0x8f   : > { %3344 = vmatprep.subr.bf16.mxu0 %v3682_v50 }
  0x92   : > { %3345 = vmatpush3.bf16.msra.mxu0 %v3682_v50 }
  0x93   : > { %3354 = vmatprep.subr.bf16.mxu0 %v3683_v42 }
  0x95   : > { %3347 = vmatmul.mubr.msk.bf16.vlgmr.msra.gmra.mrb[0].mxu0 %vm234_vm0, %v3903_v27  ;;  %v1304_v27 = vld [vmem:[#allocation2 + $0x92] sm:$0xff] }
  0x96   : > { %3355 = vmatpush3.bf16.msra.mxu0 %v3683_v42  ;;  %3350 = vmatprep.mubr.msk.bf16.mxu0 %vm234_vm0, %v3921_v33  ;;  %v1308_v33 = vpack.c.bf16 %v1304_v27, %v913_v39 }
  0x97   : > { %3356 = vmatprep.subr.bf16.mxu0 %v3684_v49 }
  0x9a   : > { %3357 = vmatpush3.bf16.msra.mxu0 %v3684_v49 }
  0x9b   : > { %3358 = vmatprep.subr.bf16.mxu0 %v3685_v23 }
  0x9d   : > { %3351 = vmatmul.mubr.msk.bf16.gmra.mrb[4].mxu0 %vm234_vm0, %v1178_v52  ;;  %v3695_v52 = vld [vmem:[%s4423_s3 + $0x40] sm:$0xff]  }
  0x9e   : > { %3359 = vmatpush3.bf16.msra.mxu0 %v3685_v23  ;;  %3362 = vmatprep.mubr.msk.bf16.mxu0 %vm234_vm0, %v3974_v57  ;;  %v3690_v57 = vld [vmem:[%s4423_s3 + $0x38] sm:$0xff]  }
  0x9f   : > { %3360 = vmatprep.subr.bf16.mxu0 %v3686_v53  ;;  %3376 = vmatprep.subr.bf16.mxu1 %v3690_v57 }
  0xa0   : > { %3377 = vmatpush3.bf16.msra.mxu1 %v3690_v57 }
  0xa1   : > { %3386 = vmatprep.subr.bf16.mxu1 %v3691_v58 }
  0xa2   : > { %3361 = vmatpush3.bf16.msra.mxu0 %v3686_v53 }
  0xa5   : > { %3363 = vmatmul.mubr.msk.bf16.vlgmr.msra.gmra.mrb[0].mxu0 %vm234_vm0, %v3981_v59  ;;  %v2905_v59 = vld [vmem:[%s4422_s2] ss:$0 sm:$0xff] }
  0xa6   : > { %3366 = vmatprep.mubr.msk.bf16.mxu0 %vm234_vm0, %v3996_v63 }
  0xad   : > { %3367 = vmatmul.mubr.msk.bf16.gmra.mrb[4].mxu0 %vm234_vm0, %v1308_v33 }
 0x178   : > { %v3364_v60 = vpop.f32.mrb[0].mxu0 }
 0x179   : > { %v1436_v61 = vadd.f32 %v3364_v60, %v2905_v59  ;;  %v1388_v62 = vpop.f32.mrb[1].mxu0  ;;  %v1722_v60 = vld [vmem:[#allocation3 + $0x2] sm:$0xff] }
 0x17a   : > { %v1434_v63 = vadd.f32 %v2905_v59, %v1388_v62  ;;  %v3365_v0 = vpop.f32.mrb[2].mxu0 }
 0x17b   : > { %v1444_v1 = vmax.f32 %v1436_v61, 0.0  ;;  %v1437_v2 = vadd.f32 %v3365_v0, %v2905_v59  ;;  %v1391_v3 = vpop.f32.mrb[3].mxu0  ;;  %v3698_v0 = vld [vmem:[%s4423_s3 + $0x58] sm:$0xff]  }
 0x17c   : > { %v1442_v11 = vmax.f32 %v1434_v63, 0.0  ;;  %v1435_v17 = vadd.f32 %v2905_v59, %v1391_v3 }
 0x17d   : > { %1473 = vst.msk [vmem:[#allocation3 + $0x31] sm:$0xff] %vm234_vm0, %v1444_v1  ;;  %v1445_v18 = vmax.f32 %v1437_v2, 0.0  ;;  %v3699_v2 = vld [vmem:[%s4423_s3 + $0x60] sm:$0xff]  }
 0x17e   : > { %1471 = vst.msk [vmem:[#allocation3 + $0x11] sm:$0xff] %vm234_vm0, %v1442_v11  ;;  %v1443_v22 = vmax.f32 %v1435_v17, 0.0 }
 0x17f   : > { %1474 = vst.msk [vmem:[#allocation3 + $0x41] sm:$0xff] %vm234_vm0, %v1445_v18 }
 0x180   : > { %1472 = vst.msk [vmem:[#allocation3 + $0x21] sm:$0xff] %vm234_vm0, %v1443_v22  ;;  %v3368_v26 = vpop.f32.mrb[4].mxu0 }
 0x181   : > { %v1440_v30 = vadd.f32 %v3368_v26, %v2905_v59  ;;  %v1404_v31 = vpop.f32.mrb[5].mxu0  ;;  %v3700_v26 = vld [vmem:[%s4423_s3 + $0x68] sm:$0xff]  }
 0x182   : > { %v1438_v32 = vadd.f32 %v2905_v59, %v1404_v31  ;;  %v3369_v34 = vpop.f32.mrb[6].mxu0  ;;  %v3701_v31 = vld [vmem:[%s4423_s3 + $0x70] sm:$0xff]  }
 0x183   : > { %v1448_v19 = vmax.f32 %v1440_v30, 0.0  ;;  %v1441_v20 = vadd.f32 %v3369_v34, %v2905_v59  ;;  %v1407_v35 = vpop.f32.mrb[7].mxu0 }
 0x184   : > { %v1446_v24 = vmax.f32 %v1438_v32, 0.0  ;;  %v1439_v25 = vadd.f32 %v2905_v59, %v1407_v35  ;;  %v4150_v39 = vld [vmem:[#allocation3 + $0x31] sm:$0xff] }
 0x185   : > { %1477 = vst.msk [vmem:[#allocation3 + $0x71] sm:$0xff] %vm234_vm0, %v1448_v19  ;;  %v1449_v28 = vmax.f32 %v1441_v20, 0.0  ;;  %v4143_v36 = vld [vmem:[#allocation3 + $0x11] sm:$0xff] }
 0x186   : > { %1475 = vst.msk [vmem:[#allocation3 + $0x51] sm:$0xff] %vm234_vm0, %v1446_v24  ;;  %v1447_v29 = vmax.f32 %v1439_v25, 0.0  ;;  %v1507_v37 = vpack.c.bf16 %v4143_v36, %v1499_v21  ;;  %v4166_v45 = vld [vmem:[#allocation3 + $0x41] sm:$0xff]  ;;  %v4174_v48 = vld [vmem:[#allocation3 + $0x10] sm:$0xff]  ;;  %v3702_v20 = vld [vmem:[%s4423_s3 + $0x78] sm:$0xff]  }
 0x187   : > { %1478 = vst.msk [vmem:[#allocation3 + $0x81] sm:$0xff] %vm234_vm0, %v1449_v28  ;;  %v4148_v38 = vld [vmem:[#allocation3 + $0x21] sm:$0xff]  ;;  %v1487_v23 = vpack.c.bf16 %v4174_v48, %v1479_v41  ;;  %v1482_v33 = vld [vmem:[#allocation3 + $0x30] sm:$0xff] }
 0x188   : > { %1476 = vst.msk [vmem:[#allocation3 + $0x61] sm:$0xff] %vm234_vm0, %v1447_v29  ;;  %3378 = vmatprep.mubr.msk.bf16.mxu1 %vm234_vm0, %v1507_v37  ;;  %v4156_v40 = vpack.c.bf16 %v4150_v39, %v4148_v38  ;;  %v1481_v53 = vld [vmem:[#allocation3 + $0x20] sm:$0xff]  ;;  %v4210_v61 = vld [vmem:[#allocation3 + $0x12] sm:$0xff]  ;;  %v3704_v25 = vld [vmem:[%s4423_s3 + $0x88] sm:$0xff]   ;;  %v1990_v41 = vpack.c.bf16 %v4148_v38, %v4143_v36 }
 0x189   : > { %v4196_v54 = vpack.c.bf16 %v1482_v33, %v1481_v53  ;;  %v1483_v55 = vld [vmem:[#allocation3 + $0x40] sm:$0xff]  ;;  %v1730_v1 = vpack.c.bf16 %v4210_v61, %v1722_v60  ;;  %v4228_v17 = vld [vmem:[#allocation3 + $0x32] sm:$0xff]  ;;  %v1860_v35 = vpack.c.bf16 %v1481_v53, %v4174_v48  ;;  %v3712_v53 = vld [vmem:[%s4423_s3 + $0xc8] sm:$0xff]  }
 0x18a   : > { %3379 = vmatmul.mubr.msk.bf16.vlgmr.msra.gmra.mrb[0].mxu1 %vm234_vm0, %v4156_v40  ;;  %v4224_v3 = vld [vmem:[#allocation3 + $0x22] sm:$0xff]  ;;  %v1861_v24 = vpack.c.bf16 %v1483_v55, %v1482_v33  ;;  %v3705_v29 = vld [vmem:[%s4423_s3 + $0x90] sm:$0xff]  }
 0x18b   : > { %3387 = vmatpush3.bf16.msra.mxu1 %v3691_v58  ;;  %v3697_v58 = vld [vmem:[%s4423_s3 + $0x50] sm:$0xff]   ;;  %v4232_v18 = vpack.c.bf16 %v4228_v17, %v4224_v3  ;;  %v4234_v22 = vld [vmem:[#allocation3 + $0x42] sm:$0xff] }
 0x18c   : > { %3388 = vmatprep.subr.bf16.mxu1 %v3692_v43  ;;  %v4178_v42 = vld [vmem:[#allocation3 + $0x71] sm:$0xff]  ;;  %v3703_v21 = vld [vmem:[%s4423_s3 + $0x80] sm:$0xff]   ;;  %v3716_v60 = vld [vmem:[%s4423_s3 + $0xe8] sm:$0xff]  }
 0x18d   : > { %v4168_v46 = vld [vmem:[#allocation3 + $0x51] sm:$0xff]  ;;  %v3707_v48 = vld [vmem:[%s4423_s3 + $0xa0] sm:$0xff]  }
 0x18e   : > { %v4172_v47 = vpack.c.bf16 %v4168_v46, %v4166_v45  ;;  %v1484_v27 = vld [vmem:[#allocation3 + $0x50] sm:$0xff]  ;;  %v4273_v37 = vld [vmem:[#allocation3 + $0x80] sm:$0xff] }
 0x18f   : > { %3389 = vmatpush3.bf16.msra.mxu1 %v3692_v43  ;;  %v4176_v50 = vld [vmem:[#allocation3 + $0x61] sm:$0xff]  ;;  %v4201_v57 = vpack.c.bf16 %v1484_v27, %v1483_v55  ;;  %v1486_v62 = vld [vmem:[#allocation3 + $0x70] sm:$0xff] }
 0x190   : > { %3382 = vmatprep.mubr.msk.bf16.mxu1 %vm234_vm0, %v4172_v47  ;;  %3390 = vmatprep.subr.bf16.mxu1 %v3693_v44  ;;  %v4184_v49 = vpack.c.bf16 %v4178_v42, %v4176_v50  ;;  %v1485_v59 = vld [vmem:[#allocation3 + $0x60] sm:$0xff]  ;;  %v4226_v11 = vld [vmem:[#allocation3 + $0x52] sm:$0xff]  ;;  %v1863_v43 = vpack.c.bf16 %v4273_v37, %v1486_v62  ;;  %v1992_v36 = vpack.c.bf16 %v4176_v50, %v4168_v46 }
 0x191   : > { %v4212_v63 = vpack.c.bf16 %v1486_v62, %v1485_v59  ;;  %v4241_v30 = vpack.c.bf16 %v4226_v11, %v4234_v22  ;;  %v1728_v32 = vld [vmem:[#allocation3 + $0x62] sm:$0xff]  ;;  %v4250_v34 = vld [vmem:[#allocation3 + $0x72] sm:$0xff]  ;;  %v1862_v28 = vpack.c.bf16 %v1485_v59, %v1484_v27  ;;  %v2120_v46 = vpack.c.bf16 %v4224_v3, %v4210_v61 }
 0x192   : > { %3383 = vmatmul.mubr.msk.bf16.gmra.mrb[4].mxu1 %vm234_vm0, %v4184_v49  ;;  %v4253_v19 = vpack.c.bf16 %v4250_v34, %v1728_v32  ;;  %v3709_v38 = vld [vmem:[%s4423_s3 + $0xb0] sm:$0xff]   ;;  %v3711_v50 = vld [vmem:[%s4423_s3 + $0xc0] sm:$0xff]   ;;  %v2122_v27 = vpack.c.bf16 %v1728_v32, %v4226_v11  ;;  %v3722_v3 = vld [vmem:[%s4423_s3 + $0x118] sm:$0xff]  }
 0x193   : > { %3391 = vmatpush3.bf16.msra.mxu1 %v3693_v44  ;;  %3394 = vmatprep.mubr.msk.bf16.mxu1 %vm234_vm0, %v1487_v23  ;;  %v3706_v44 = vld [vmem:[%s4423_s3 + $0x98] sm:$0xff]   ;;  %v3708_v23 = vld [vmem:[%s4423_s3 + $0xa8] sm:$0xff]   ;;  %v3713_v33 = vld [vmem:[%s4423_s3 + $0xd0] sm:$0xff]  }
 0x194   : > { %3392 = vmatprep.subr.bf16.mxu1 %v3694_v51  ;;  %v2119_v55 = vld [vmem:[#allocation3 + $0x82] sm:$0xff]  ;;  %v2250_v61 = vld [vmem:[#allocation3 + $0x90] sm:$0xff]  ;;  %v3042_v11 = vld [vmem:[%s4424_s4] ss:$0 sm:$0xff] }
 0x195   : > { %v3715_v59 = vld [vmem:[%s4423_s3 + $0xe0] sm:$0xff]   ;;  %v2254_v62 = vpack.c.bf16 %v2250_v61, %v4273_v37 }
 0x197   : > { %3393 = vmatpush3.bf16.msra.mxu1 %v3694_v51  ;;  %v1991_v51 = vpack.c.bf16 %v4166_v45, %v4150_v39  ;;  %v3710_v45 = vld [vmem:[%s4423_s3 + $0xb8] sm:$0xff]  }
 0x198   : > { %3402 = vmatprep.subr.bf16.mxu1 %v3695_v52 }
 0x19a   : > { %3395 = vmatmul.mubr.msk.bf16.vlgmr.msra.gmra.mrb[0].mxu1 %vm234_vm0, %v4196_v54 }
 0x19b   : > { %3403 = vmatpush3.bf16.msra.mxu1 %v3695_v52  ;;  %3398 = vmatprep.mubr.msk.bf16.mxu1 %vm234_vm0, %v4201_v57  ;;  %v4298_v52 = vld [vmem:[#allocation3 + $0x81] sm:$0xff] }
 0x19c   : > { %3404 = vmatprep.subr.bf16.mxu1 %v3696_v56  ;;  %v1993_v39 = vpack.c.bf16 %v4298_v52, %v4178_v42  ;;  %v2121_v42 = vpack.c.bf16 %v4234_v22, %v4228_v17 }
 0x19f   : > { %3405 = vmatpush3.bf16.msra.mxu1 %v3696_v56  ;;  %v2123_v56 = vpack.c.bf16 %v2119_v55, %v4250_v34 }
 0x1a0   : > { %3406 = vmatprep.subr.bf16.mxu1 %v3697_v58 }
 0x1a2   : > { %3399 = vmatmul.mubr.msk.bf16.gmra.mrb[4].mxu1 %vm234_vm0, %v4212_v63 }
 0x1a3   : > { %3407 = vmatpush3.bf16.msra.mxu1 %v3697_v58  ;;  %3410 = vmatprep.mubr.msk.bf16.mxu1 %vm234_vm0, %v1730_v1  ;;  %v3714_v58 = vld [vmem:[%s4423_s3 + $0xd8] sm:$0xff]  }
 0x1a4   : > { %3408 = vmatprep.subr.bf16.mxu1 %v3698_v0  ;;  %v2380_v1 = vld [vmem:[#allocation3 + $0x91] sm:$0xff] }
 0x1a7   : > { %3409 = vmatpush3.bf16.msra.mxu1 %v3698_v0  ;;  %v3718_v0 = vld [vmem:[%s4423_s3 + $0xf8] sm:$0xff]  }
 0x1a8   : > { %3418 = vmatprep.subr.bf16.mxu1 %v3699_v2 }
 0x1aa   : > { %3411 = vmatmul.mubr.msk.bf16.vlgmr.msra.gmra.mrb[0].mxu1 %vm234_vm0, %v4232_v18 }
 0x1ab   : > { %3419 = vmatpush3.bf16.msra.mxu1 %v3699_v2  ;;  %3414 = vmatprep.mubr.msk.bf16.mxu1 %vm234_vm0, %v4241_v30  ;;  %v2384_v2 = vpack.c.bf16 %v2380_v1, %v4298_v52 }
 0x1ac   : > { %3420 = vmatprep.subr.bf16.mxu1 %v3700_v26 }
 0x1af   : > { %3421 = vmatpush3.bf16.msra.mxu1 %v3700_v26 }
 0x1b0   : > { %3422 = vmatprep.subr.bf16.mxu1 %v3701_v31 }
 0x1b2   : > { %3415 = vmatmul.mubr.msk.bf16.gmra.mrb[4].mxu1 %vm234_vm0, %v4253_v19 }
 0x1b3   : > { %3423 = vmatpush3.bf16.msra.mxu1 %v3701_v31  ;;  %3426 = vmatprep.mubr.msk.bf16.mxu1 %vm234_vm0, %v1860_v35 }
 0x1b4   : > { %3424 = vmatprep.subr.bf16.mxu1 %v3702_v20 }
 0x1b7   : > { %3425 = vmatpush3.bf16.msra.mxu1 %v3702_v20 }
 0x1b8   : > { %3434 = vmatprep.subr.bf16.mxu1 %v3703_v21 }
 0x1ba   : > { %3427 = vmatmul.mubr.msk.bf16.vlgmr.msra.gmra.mrb[0].mxu1 %vm234_vm0, %v1861_v24 }
 0x1bb   : > { %3435 = vmatpush3.bf16.msra.mxu1 %v3703_v21  ;;  %3430 = vmatprep.mubr.msk.bf16.mxu1 %vm234_vm0, %v1862_v28 }
 0x1bc   : > { %3436 = vmatprep.subr.bf16.mxu1 %v3704_v25 }
 0x1bf   : > { %3437 = vmatpush3.bf16.msra.mxu1 %v3704_v25 }
 0x1c0   : > { %3438 = vmatprep.subr.bf16.mxu1 %v3705_v29 }
 0x1c2   : > { %3431 = vmatmul.mubr.msk.bf16.gmra.mrb[4].mxu1 %vm234_vm0, %v1863_v43 }
 0x1c3   : > { %3439 = vmatpush3.bf16.msra.mxu1 %v3705_v29  ;;  %3442 = vmatprep.mubr.msk.bf16.mxu1 %vm234_vm0, %v1990_v41 }
 0x1c4   : > { %3440 = vmatprep.subr.bf16.mxu1 %v3706_v44 }
 0x1c7   : > { %3441 = vmatpush3.bf16.msra.mxu1 %v3706_v44 }
 0x1c8   : > { %3450 = vmatprep.subr.bf16.mxu1 %v3707_v48 }
 0x1ca   : > { %3443 = vmatmul.mubr.msk.bf16.vlgmr.msra.gmra.mrb[0].mxu1 %vm234_vm0, %v1991_v51 }
 0x1cb   : > { %3451 = vmatpush3.bf16.msra.mxu1 %v3707_v48  ;;  %3446 = vmatprep.mubr.msk.bf16.mxu1 %vm234_vm0, %v1992_v36 }
 0x1cc   : > { %3452 = vmatprep.subr.bf16.mxu1 %v3708_v23 }
 0x1cf   : > { %3453 = vmatpush3.bf16.msra.mxu1 %v3708_v23 }
 0x1d0   : > { %3454 = vmatprep.subr.bf16.mxu1 %v3709_v38 }
 0x1d2   : > { %3447 = vmatmul.mubr.msk.bf16.gmra.mrb[4].mxu1 %vm234_vm0, %v1993_v39 }
 0x1d3   : > { %3455 = vmatpush3.bf16.msra.mxu1 %v3709_v38  ;;  %3458 = vmatprep.mubr.msk.bf16.mxu1 %vm234_vm0, %v2120_v46 }
 0x1d4   : > { %3456 = vmatprep.subr.bf16.mxu1 %v3710_v45 }
 0x1d7   : > { %3457 = vmatpush3.bf16.msra.mxu1 %v3710_v45 }
 0x1d8   : > { %3466 = vmatprep.subr.bf16.mxu1 %v3711_v50 }
 0x1da   : > { %3459 = vmatmul.mubr.msk.bf16.vlgmr.msra.gmra.mrb[0].mxu1 %vm234_vm0, %v2121_v42 }
 0x1db   : > { %3467 = vmatpush3.bf16.msra.mxu1 %v3711_v50  ;;  %3462 = vmatprep.mubr.msk.bf16.mxu1 %vm234_vm0, %v2122_v27 }
 0x1dc   : > { %3468 = vmatprep.subr.bf16.mxu1 %v3712_v53 }
 0x1df   : > { %3469 = vmatpush3.bf16.msra.mxu1 %v3712_v53 }
 0x1e0   : > { %3470 = vmatprep.subr.bf16.mxu1 %v3713_v33 }
 0x1e2   : > { %3463 = vmatmul.mubr.msk.bf16.gmra.mrb[4].mxu1 %vm234_vm0, %v2123_v56 }
 0x1e3   : > { %3471 = vmatpush3.bf16.msra.mxu1 %v3713_v33  ;;  %3474 = vmatprep.mubr.msk.bf16.mxu1 %vm234_vm0, %v4196_v54  ;;  %v3717_v54 = vld [vmem:[%s4423_s3 + $0xf0] sm:$0xff]  }
 0x1e4   : > { %3472 = vmatprep.subr.bf16.mxu1 %v3714_v58 }
 0x1e7   : > { %3473 = vmatpush3.bf16.msra.mxu1 %v3714_v58 }
 0x1e8   : > { %3482 = vmatprep.subr.bf16.mxu1 %v3715_v59 }
 0x1ea   : > { %3475 = vmatmul.mubr.msk.bf16.vlgmr.msra.gmra.mrb[0].mxu1 %vm234_vm0, %v4201_v57  ;;  %v3719_v57 = vld [vmem:[%s4423_s3 + $0x100] sm:$0xff]  }
 0x1eb   : > { %3483 = vmatpush3.bf16.msra.mxu1 %v3715_v59  ;;  %3478 = vmatprep.mubr.msk.bf16.mxu1 %vm234_vm0, %v4212_v63  ;;  %v3720_v63 = vld [vmem:[%s4423_s3 + $0x108] sm:$0xff]  }
 0x1ec   : > { %3484 = vmatprep.subr.bf16.mxu1 %v3716_v60 }
 0x1ef   : > { %3485 = vmatpush3.bf16.msra.mxu1 %v3716_v60 }
 0x1f0   : > { %3486 = vmatprep.subr.bf16.mxu1 %v3717_v54 }
 0x1f2   : > { %3479 = vmatmul.mubr.msk.bf16.gmra.mrb[4].mxu1 %vm234_vm0, %v2254_v62 }
 0x1f3   : > { %3487 = vmatpush3.bf16.msra.mxu1 %v3717_v54  ;;  %3490 = vmatprep.mubr.msk.bf16.mxu1 %vm234_vm0, %v4156_v40  ;;  %v3721_v40 = vld [vmem:[%s4423_s3 + $0x110] sm:$0xff]  }
 0x1f4   : > { %3488 = vmatprep.subr.bf16.mxu1 %v3718_v0 }
 0x1f7   : > { %3489 = vmatpush3.bf16.msra.mxu1 %v3718_v0 }
 0x1f8   : > { %3498 = vmatprep.subr.bf16.mxu1 %v3719_v57 }
 0x1fa   : > { %3491 = vmatmul.mubr.msk.bf16.vlgmr.msra.gmra.mrb[0].mxu1 %vm234_vm0, %v4172_v47  ;;  %v2510_v47 = vld [vmem:[#allocation3 + $0x92] sm:$0xff] }
 0x1fb   : > { %3499 = vmatpush3.bf16.msra.mxu1 %v3719_v57  ;;  %3494 = vmatprep.mubr.msk.bf16.mxu1 %vm234_vm0, %v4184_v49  ;;  %v2514_v49 = vpack.c.bf16 %v2510_v47, %v2119_v55 }
 0x1fc   : > { %3500 = vmatprep.subr.bf16.mxu1 %v3720_v63 }
 0x1ff   : > { %3501 = vmatpush3.bf16.msra.mxu1 %v3720_v63 }
 0x200   : > { %3502 = vmatprep.subr.bf16.mxu1 %v3721_v40 }
 0x202   : > { %3495 = vmatmul.mubr.msk.bf16.gmra.mrb[4].mxu1 %vm234_vm0, %v2384_v2 }
 0x203   : > { %3503 = vmatpush3.bf16.msra.mxu1 %v3721_v40  ;;  %3506 = vmatprep.mubr.msk.bf16.mxu1 %vm234_vm0, %v4232_v18 }
 0x204   : > { %3504 = vmatprep.subr.bf16.mxu1 %v3722_v3 }
 0x207   : > { %3505 = vmatpush3.bf16.msra.mxu1 %v3722_v3 }
 0x20a   : > { %3507 = vmatmul.mubr.msk.bf16.vlgmr.msra.gmra.mrb[0].mxu1 %vm234_vm0, %v4241_v30 }
 0x20b   : > { %3510 = vmatprep.mubr.msk.bf16.mxu1 %vm234_vm0, %v4253_v19 }
 0x212   : > { %3511 = vmatmul.mubr.msk.bf16.gmra.mrb[4].mxu1 %vm234_vm0, %v2514_v49 }
 0x2dd   : > { %v3508_v17 = vpop.f32.mrb[0].mxu1 }
 0x2de   : > { %v2642_v22 = vadd.f32 %v3508_v17, %v3042_v11  ;;  %v2594_v18 = vpop.f32.mrb[1].mxu1 }
 0x2df   : > { %v2640_v26 = vadd.f32 %v3042_v11, %v2594_v18  ;;  %v3509_v31 = vpop.f32.mrb[2].mxu1 }
 0x2e0   : > { %v2650_v30 = vadd.f32 %v3069_v8, %v2642_v22  ;;  %v2643_v32 = vadd.f32 %v3509_v31, %v3042_v11  ;;  %v2597_v34 = vpop.f32.mrb[3].mxu1 }
 0x2e1   : > { %v2648_v19 = vadd.f32 %v3065_v6, %v2640_v26  ;;  %v2641_v20 = vadd.f32 %v3042_v11, %v2597_v34 }
 0x2e2   : > { %v2658_v35 = vmax.f32 %v2650_v30, 0.0  ;;  %v2651_v21 = vadd.f32 %v3070_v9, %v2643_v32 }
 0x2e3   : > { %v2656_v8 = vmax.f32 %v2648_v19, 0.0  ;;  %v2649_v24 = vadd.f32 %v3066_v7, %v2641_v20 }
 0x2e4   : > { %v3057_v6 = vpack.c.bf16 %v2658_v35, %v2658_v35  ;;  %v2659_v25 = vmax.f32 %v2651_v21, 0.0 }
 0x2e5   : > { %v3055_v28 = vpack.c.bf16 %v2656_v8, %v2656_v8  ;;  %v2657_v5 = vmax.f32 %v2649_v24, 0.0  ;;  %v3512_v9 = vpop.f32.mrb[4].mxu1 }
 0x2e6   : > { %2699 = vst.msk [vmem:[%s4389_s17 + $0x8] sm:$0xf] %vm2696_vm2, %v3057_v6  ;;  %v3058_v29 = vpack.c.bf16 %v2659_v25, %v2659_v25  ;;  %v2646_v37 = vadd.f32 %v3512_v9, %v3042_v11  ;;  %v2610_v43 = vpop.f32.mrb[5].mxu1 }
 0x2e7   : > { %2697 = vst.msk [vmem:[%s4389_s17] sm:$0xf] %vm2696_vm2, %v3055_v28  ;;  %v3056_v44 = vpack.c.bf16 %v2657_v5, %v2657_v5  ;;  %v2644_v41 = vadd.f32 %v3042_v11, %v2610_v43  ;;  %v3513_v48 = vpop.f32.mrb[6].mxu1 }
 0x2e8   : > { %2700 = vst.msk [vmem:[%s4389_s17 + $0xc] sm:$0xf] %vm2696_vm2, %v3058_v29  ;;  %v2654_v4 = vadd.f32 %v3077_v15, %v2646_v37  ;;  %v2647_v7 = vadd.f32 %v3513_v48, %v3042_v11  ;;  %v2613_v51 = vpop.f32.mrb[7].mxu1 }
 0x2e9   : > { %2698 = vst.msk [vmem:[%s4389_s17 + $0x4] sm:$0xf] %vm2696_vm2, %v3056_v44  ;;  %v2652_v23 = vadd.f32 %v3073_v12, %v2644_v41  ;;  %v2645_v36 = vadd.f32 %v3042_v11, %v2613_v51 }
 0x2ea   : > { %v2662_v38 = vmax.f32 %v2654_v4, 0.0  ;;  %v2655_v52 = vadd.f32 %v3078_v16, %v2647_v7 }
 0x2eb   : > { %v2660_v39 = vmax.f32 %v2652_v23, 0.0  ;;  %v2653_v45 = vadd.f32 %v3074_v13, %v2645_v36 }
 0x2ec   : > { %v3061_v15 = vpack.c.bf16 %v2662_v38, %v2662_v38  ;;  %v2663_v46 = vmax.f32 %v2655_v52, 0.0 }
 0x2ed   : > { %v3059_v50 = vpack.c.bf16 %v2660_v39, %v2660_v39  ;;  %v2661_v42 = vmax.f32 %v2653_v45, 0.0 }
 0x2ee   : > { %2703 = vst.msk [vmem:[%s4389_s17 + $0x18] sm:$0xf] %vm2696_vm2, %v3061_v15  ;;  %v3062_v53 = vpack.c.bf16 %v2663_v46, %v2663_v46 }
 0x2ef   : > { %2701 = vst.msk [vmem:[%s4389_s17 + $0x10] sm:$0xf] %vm2696_vm2, %v3059_v50  ;;  %v3060_v27 = vpack.c.bf16 %v2661_v42, %v2661_v42 }
 0x2f0   : > { %2704 = vst.msk [vmem:[%s4389_s17 + $0x1c] sm:$0xf] %vm2696_vm2, %v3062_v53 }
 0x2f1   : > { %2702 = vst.msk [vmem:[%s4389_s17 + $0x14] sm:$0xf] %vm2696_vm2, %v3060_v27 }
 0x2f2 PF: > { %s15_s18 = sadd.s32 1, %s3729_s18  }
 0x2f3   : > { %p12_p4 = scmp.ge.s32.totalorder %s15_s18, 4  }
 0x2f5   :  { %14 = sbr.rel (!%p12_p4) target bundleno = 1 (0x1), region = 90 }

</bundles_post_ra>
